<compile_context>
chip_gen: v5e
topology: v5e:2x2
jax: 0.10.0
libtpu: 0.0.40
codegen_flags: <defaults>
</compile_context>

<pallas_src>
import jax
import jax.numpy as jnp
from jax.experimental import pallas as pl
from jax.experimental.pallas import tpu as pltpu

# ---- config (mirrors opt.channels / opt.img_size, kept small) ----
CHANNELS = 4
IMG_SIZE = 16
IMG_SHAPE = (CHANNELS, IMG_SIZE, IMG_SIZE)
IMG_FLAT = CHANNELS * IMG_SIZE * IMG_SIZE        # 1024 = int(np.prod(img_shape))
H1, H2 = 512, 256
LRELU_SLOPE = 0.2

# packed-vector layout: [b1 (512) | b2 (256) | w3 row (256) | b3 (1) | pad]
_B1_OFF = 0
_B2_OFF = _B1_OFF + H1           # 512
_W3_OFF = _B2_OFF + H2           # 768
_B3_OFF = _W3_OFF + H2           # 1024
VEC_LEN = 1152                   # padded to a multiple of 128 lanes


def _discriminator_kernel(x_ref, w1_ref, w2_ref, vec_ref, out_ref):
    def lrelu(v):
        return jnp.where(v > 0, v, LRELU_SLOPE * v)

    x = x_ref[...]                                      # (B, 1024) f32

    b1 = vec_ref[:, _B1_OFF:_B1_OFF + H1]               # (1, 512) f32
    b2 = vec_ref[:, _B2_OFF:_B2_OFF + H2]               # (1, 256) f32
    w3 = vec_ref[:, _W3_OFF:_W3_OFF + H2]               # (1, 256) f32
    b3 = vec_ref[:, _B3_OFF:_B3_OFF + 1]                # (1, 1)   f32

    # Linear(1024, 512) + LeakyReLU(0.2): bf16 MXU inputs, f32 accumulate.
    h = jnp.dot(x.astype(jnp.bfloat16), w1_ref[...],
                preferred_element_type=jnp.float32) + b1
    h = lrelu(h)

    # Linear(512, 256) + LeakyReLU(0.2)
    h = jnp.dot(h.astype(jnp.bfloat16), w2_ref[...],
                preferred_element_type=jnp.float32) + b2
    h = lrelu(h)

    # Linear(256, 1): done as elementwise multiply + lane reduction (avoids a
    # degenerate 1-column MXU op), all in f32.
    out_ref[...] = jnp.sum(h * w3, axis=-1, keepdims=True) + b3


_VMEM_SPEC = pl.BlockSpec(memory_space=pltpu.MemorySpace.VMEM)


@jax.jit
def discriminator_forward(img, w1_bf16, w2_bf16, vec):
    """img: (B, C, H, W) f32 -> validity: (B, 1) f32."""
    B = img.shape[0]
    img_flat = img.reshape(B, -1).astype(jnp.float32)   # == img.view(B, -1)
    return pl.pallas_call(
        _discriminator_kernel,
        out_shape=jax.ShapeDtypeStruct((B, 1), jnp.float32),
        in_specs=[_VMEM_SPEC, _VMEM_SPEC, _VMEM_SPEC, _VMEM_SPEC],
        out_specs=_VMEM_SPEC,
        compiler_params=pltpu.CompilerParams(
            vmem_limit_bytes=32 * 1024 * 1024),
    )(img_flat, w1_bf16, w2_bf16, vec)


def init_params(key):
    """PyTorch-default Linear init: W, b ~ U(-1/sqrt(fan_in), 1/sqrt(fan_in))."""
    dims = [(IMG_FLAT, H1), (H1, H2), (H2, 1)]
    keys = jax.random.split(key, 2 * len(dims))
    ws, bs = [], []
    for i, (fan_in, fan_out) in enumerate(dims):
        bound = 1.0 / (fan_in ** 0.5)
        ws.append(jax.random.uniform(keys[2 * i], (fan_in, fan_out),
                                     minval=-bound, maxval=bound,
                                     dtype=jnp.float32))
        bs.append(jax.random.uniform(keys[2 * i + 1], (fan_out,),
                                     minval=-bound, maxval=bound,
                                     dtype=jnp.float32))
    w1 = ws[0].astype(jnp.bfloat16)          # (1024, 512) bf16
    w2 = ws[1].astype(jnp.bfloat16)          # (512, 256)  bf16
    # Pack all small per-layer vectors into one lane-padded f32 row.
    vec = jnp.zeros((1, VEC_LEN), jnp.float32)
    vec = vec.at[0, _B1_OFF:_B1_OFF + H1].set(bs[0])
    vec = vec.at[0, _B2_OFF:_B2_OFF + H2].set(bs[1])
    vec = vec.at[0, _W3_OFF:_W3_OFF + H2].set(ws[2][:, 0])
    vec = vec.at[0, _B3_OFF:_B3_OFF + 1].set(bs[2])
    return w1, w2, vec


if __name__ == "__main__":
    key = jax.random.PRNGKey(0)
    pkey, xkey = jax.random.split(key)
    w1, w2, vec = init_params(pkey)

    B = 2
    img = jax.random.normal(xkey, (B, *IMG_SHAPE), dtype=jnp.float32)

    validity = discriminator_forward(img, w1, w2, vec)
    jax.block_until_ready(validity)

    assert validity.shape == (B, 1), validity.shape
    assert validity.dtype == jnp.float32
    print("KERNEL_OK")
</pallas_src>

<mosaic_0001>
module attributes {stable_mosaic.version = 11 : i64} {
  func.func @_discriminator_kernel(%arg0: memref<2x1024xf32, #tpu.memory_space<vmem>>, %arg1: memref<1024x512xbf16, #tpu.memory_space<vmem>>, %arg2: memref<512x256xbf16, #tpu.memory_space<vmem>>, %arg3: memref<1x1152xf32, #tpu.memory_space<vmem>>, %arg4: memref<2x1xf32, #tpu.memory_space<vmem>>) attributes {dimension_semantics = [], scalar_prefetch = 0 : i64, scratch_operands = 0 : i64, tpu.core_type = #tpu.core_type<tc>} {
    %c0 = arith.constant 0 : index
    %c0_0 = arith.constant 0 : index
    %0 = vector.load %arg0[%c0, %c0_0] : memref<2x1024xf32, #tpu.memory_space<vmem>>, vector<2x1024xf32>
    %c0_1 = arith.constant 0 : index
    %c0_2 = arith.constant 0 : index
    %1 = vector.load %arg3[%c0_1, %c0_2] : memref<1x1152xf32, #tpu.memory_space<vmem>>, vector<1x512xf32>
    %c0_3 = arith.constant 0 : index
    %c512 = arith.constant 512 : index
    %2 = vector.load %arg3[%c0_3, %c512] : memref<1x1152xf32, #tpu.memory_space<vmem>>, vector<1x256xf32>
    %c0_4 = arith.constant 0 : index
    %c768 = arith.constant 768 : index
    %3 = vector.load %arg3[%c0_4, %c768] : memref<1x1152xf32, #tpu.memory_space<vmem>>, vector<1x256xf32>
    %c0_5 = arith.constant 0 : index
    %c1024 = arith.constant 1024 : index
    %4 = vector.load %arg3[%c0_5, %c1024] : memref<1x1152xf32, #tpu.memory_space<vmem>>, vector<1x1xf32>
    %5 = arith.truncf %0 : vector<2x1024xf32> to vector<2x1024xbf16>
    %c0_6 = arith.constant 0 : index
    %c0_7 = arith.constant 0 : index
    %6 = vector.load %arg1[%c0_6, %c0_7] : memref<1024x512xbf16, #tpu.memory_space<vmem>>, vector<1024x512xbf16>
    %cst = arith.constant dense<0.000000e+00> : vector<2x512xf32>
    %7 = tpu.matmul %5, %6, %cst {dimension_numbers = #tpu.dot_dimension_numbers<[1], [0], [0], [1], [0, 0, 1, 1], [], []>} : vector<2x1024xbf16>, vector<1024x512xbf16>, vector<2x512xf32> -> vector<2x512xf32>
    %8 = vector.broadcast %1 : vector<1x512xf32> to vector<2x512xf32>
    %9 = arith.addf %7, %8 : vector<2x512xf32>
    %cst_8 = arith.constant 0.000000e+00 : f32
    %10 = vector.broadcast %cst_8 : f32 to vector<2x512xf32>
    %11 = arith.cmpf ogt, %9, %10 : vector<2x512xf32>
    %cst_9 = arith.constant 2.000000e-01 : f32
    %12 = vector.broadcast %cst_9 : f32 to vector<2x512xf32>
    %13 = arith.mulf %12, %9 : vector<2x512xf32>
    %14 = arith.select %11, %9, %13 : vector<2x512xi1>, vector<2x512xf32>
    %15 = arith.truncf %14 : vector<2x512xf32> to vector<2x512xbf16>
    %c0_10 = arith.constant 0 : index
    %c0_11 = arith.constant 0 : index
    %16 = vector.load %arg2[%c0_10, %c0_11] : memref<512x256xbf16, #tpu.memory_space<vmem>>, vector<512x256xbf16>
    %cst_12 = arith.constant dense<0.000000e+00> : vector<2x256xf32>
    %17 = tpu.matmul %15, %16, %cst_12 {dimension_numbers = #tpu.dot_dimension_numbers<[1], [0], [0], [1], [0, 0, 1, 1], [], []>} : vector<2x512xbf16>, vector<512x256xbf16>, vector<2x256xf32> -> vector<2x256xf32>
    %18 = vector.broadcast %2 : vector<1x256xf32> to vector<2x256xf32>
    %19 = arith.addf %17, %18 : vector<2x256xf32>
    %cst_13 = arith.constant 0.000000e+00 : f32
    %20 = vector.broadcast %cst_13 : f32 to vector<2x256xf32>
    %21 = arith.cmpf ogt, %19, %20 : vector<2x256xf32>
    %cst_14 = arith.constant 2.000000e-01 : f32
    %22 = vector.broadcast %cst_14 : f32 to vector<2x256xf32>
    %23 = arith.mulf %22, %19 : vector<2x256xf32>
    %24 = arith.select %21, %19, %23 : vector<2x256xi1>, vector<2x256xf32>
    %25 = vector.broadcast %3 : vector<1x256xf32> to vector<2x256xf32>
    %26 = arith.mulf %24, %25 : vector<2x256xf32>
    %cst_15 = arith.constant dense<0.000000e+00> : vector<2xf32>
    %27 = vector.multi_reduction <add>, %26, %cst_15 [1] : vector<2x256xf32> to vector<2xf32>
    %28 = vector.shape_cast %27 : vector<2xf32> to vector<2x1xf32>
    %29 = vector.broadcast %4 : vector<1x1xf32> to vector<2x1xf32>
    %30 = arith.addf %28, %29 : vector<2x1xf32>
    %c0_16 = arith.constant 0 : index
    %c0_17 = arith.constant 0 : index
    %31 = vector.load %arg4[%c0_16, %c0_17] : memref<2x1xf32, #tpu.memory_space<vmem>>, vector<2x1xf32>
    tpu.vector_store %arg4[%c0_16, %c0_17], %30 {strides = array<i32>} : memref<2x1xf32, #tpu.memory_space<vmem>>, vector<2x1xf32>,
    return
  }
}

</mosaic_0001>

<bundles_post_ra>
// kernel: discriminator_forward.1
= control target key start
LH: loop header
LB: loop body
LE: loop exit
PB: predicated region body
PF: predicated region fallthrough
CT: control target
= control target key end

     0   :  { %9 = vsyncpa [#allocation3], 0  ;;  %s4390_s0 = inlined_call_operand.vmem [shape: f32[2,1024], index: 0, kind: input, shape index: {}]   ;;  %s4391_s1 = inlined_call_operand.hbm [shape: bf16[1024,512], index: 1, kind: input, shape index: {}]   ;;  %s4392_s2 = inlined_call_operand.hbm [shape: bf16[512,256], index: 2, kind: input, shape index: {}]   ;;  %s4393_s3 = inlined_call_operand.vmem [shape: f32[1,1152], index: 3, kind: input, shape index: {}]   ;;  %s4394_s4 = inlined_call_operand.vmem [shape: f32[2,1], index: 4, kind: output, shape index: {}]  }
   0x1   :  { %s17_s17 = sshll.u32 %s4391_s1, 4  ;;  %s18_s17 = int_to_ptr.hbm [resolvable:$true] %s17_s17 }
   0x2   :  { %10 = vsyncpa [#allocation5], 0  ;;  %s4245_s18 = smov [#allocation2]   ;;  %s30_s22 = sshll.u32 %s4392_s2, 4  ;;  %s31_s22 = int_to_ptr.hbm [resolvable:$true] %s30_s22 }
   0x3   :  { %s19_s19 = sshll.u32 %s4245_s18, 4  ;;  %s4246_s23 = smov 256   ;;  %s20_s19 = int_to_ptr.vmem [resolvable:$true] %s19_s19 }
   0x4   :  { %s4247_s24 = smov 16   ;;  %s4248_s25 = smov [#allocation4]  }
   0x5   :  { %25 = dma.hbm_to_vmem [thread:$0]  %s18_s17, 32768, %s20_s19, [#allocation3], %s4246_s23, %s4246_s23, %s4247_s24  }
   0x6   :  { %s32_s26 = sshll.u32 %s4248_s25, 4  ;;  %s4249_s27 = smov 128   ;;  %s33_s26 = int_to_ptr.vmem [resolvable:$true] %s32_s26 }
   0x7   :  { %s4250_s28 = smov 8  }
   0x8   :  { %38 = dma.hbm_to_vmem [thread:$0]  %s31_s22, 8192, %s33_s26, [#allocation5], %s4249_s27, %s4249_s27, %s4250_s28  }
   0x9   :  { %4241 = dma.done.wait [#allocation3], 32768  }
   0xa   :  { %4242 = vsyncadd [#allocation3], 4294934528 }
   0xb   :  { %4243 = dma.done.wait [#allocation5], 8192  }
   0xc   :  { %4244 = vsyncadd [#allocation5], 4294959104  ;;  %v2699_v0 = vld [vmem:[#allocation2 + $0xe0] sm:$0xf]  ;;  %v3895_v1 = vld [vmem:[#allocation2 + $0xec] sm:$0xf0] }
   0xd   :  { %v2827_v2 = vld [vmem:[#allocation2 + $0x1e0] sm:$0xf]  ;;  %v2700_v3 = vor.u32 %v3895_v1, %v2699_v0  ;;  %v3927_v4 = vld [vmem:[#allocation2 + $0x1ec] sm:$0xf0]  ;;  %vm2567_vm6 = vcmask 1041408   ;;  %vm2577_vm7 = vcmask 1024  }
   0xe   :  { %v2955_v5 = vld [vmem:[#allocation2 + $0x2e0] sm:$0xf]  ;;  %v3959_v6 = vld [vmem:[#allocation2 + $0x2ec] sm:$0xf0]  ;;  %v2828_v7 = vor.u32 %v3927_v4, %v2827_v2 }
   0xf   :  { %v2956_v8 = vor.u32 %v3959_v6, %v2955_v5  ;;  %v3083_v9 = vld [vmem:[#allocation2 + $0x3e0] sm:$0xf]  ;;  %v3991_v10 = vld [vmem:[#allocation2 + $0x3ec] sm:$0xf0]  ;;  %1629 = vmatpush.bf16.msra.mxu0 %v2700_v3 }
  0x10   :  { %v2683_v11 = vld [vmem:[#allocation2 + $0xc0] sm:$0xf]  ;;  %v3084_v12 = vor.u32 %v3991_v10, %v3083_v9  ;;  %v3891_v13 = vld [vmem:[#allocation2 + $0xcc] sm:$0xf0]  ;;  %1642 = vmatpush.bf16.msra.mxu1 %v2828_v7 }
  0x11   :  { %v2811_v14 = vld [vmem:[#allocation2 + $0x1c0] sm:$0xf]  ;;  %v3923_v15 = vld [vmem:[#allocation2 + $0x1cc] sm:$0xf0]  ;;  %1655 = vmatpush.bf16.msra.mxu2 %v2956_v8  ;;  %v2684_v16 = vor.u32 %v3891_v13, %v2683_v11 }
  0x12   :  { %v2812_v17 = vor.u32 %v3923_v15, %v2811_v14  ;;  %v2939_v18 = vld [vmem:[#allocation2 + $0x2c0] sm:$0xf]  ;;  %v3955_v19 = vld [vmem:[#allocation2 + $0x2cc] sm:$0xf0]  ;;  %1668 = vmatpush.bf16.msra.mxu3 %v3084_v12 }
  0x13   :  { %v3067_v20 = vld [vmem:[#allocation2 + $0x3c0] sm:$0xf]  ;;  %v2940_v21 = vor.u32 %v3955_v19, %v2939_v18  ;;  %v3987_v22 = vld [vmem:[#allocation2 + $0x3cc] sm:$0xf0]  ;;  %1630 = vmatpush.bf16.msra.mxu0 %v2684_v16 }
  0x14   :  { %v2667_v23 = vld [vmem:[#allocation2 + $0xa0] sm:$0xf]  ;;  %v3887_v24 = vld [vmem:[#allocation2 + $0xac] sm:$0xf0]  ;;  %v3068_v25 = vor.u32 %v3987_v22, %v3067_v20  ;;  %1643 = vmatpush.bf16.msra.mxu1 %v2812_v17 }
  0x15   :  { %v2795_v26 = vld [vmem:[#allocation2 + $0x1a0] sm:$0xf]  ;;  %v3919_v27 = vld [vmem:[#allocation2 + $0x1ac] sm:$0xf0]  ;;  %v2668_v29 = vor.u32 %v3887_v24, %v2667_v23  ;;  %1656 = vmatpush.bf16.msra.mxu2 %v2940_v21 }
  0x16   :  { %v2923_v28 = vld [vmem:[#allocation2 + $0x2a0] sm:$0xf]  ;;  %v3951_v30 = vld [vmem:[#allocation2 + $0x2ac] sm:$0xf0]  ;;  %v2796_v33 = vor.u32 %v3919_v27, %v2795_v26  ;;  %1669 = vmatpush.bf16.msra.mxu3 %v3068_v25 }
  0x17   :  { %v3051_v31 = vld [vmem:[#allocation2 + $0x3a0] sm:$0xf]  ;;  %v3983_v32 = vld [vmem:[#allocation2 + $0x3ac] sm:$0xf0]  ;;  %v2924_v34 = vor.u32 %v3951_v30, %v2923_v28  ;;  %1631 = vmatpush.bf16.msra.mxu0 %v2668_v29 }
  0x18   :  { %v2651_v35 = vld [vmem:[#allocation2 + $0x80] sm:$0xf]  ;;  %v3883_v36 = vld [vmem:[#allocation2 + $0x8c] sm:$0xf0]  ;;  %v3052_v38 = vor.u32 %v3983_v32, %v3051_v31  ;;  %1644 = vmatpush.bf16.msra.mxu1 %v2796_v33 }
  0x19   :  { %v2779_v37 = vld [vmem:[#allocation2 + $0x180] sm:$0xf]  ;;  %v3915_v39 = vld [vmem:[#allocation2 + $0x18c] sm:$0xf0]  ;;  %v2652_v44 = vor.u32 %v3883_v36, %v2651_v35  ;;  %1657 = vmatpush.bf16.msra.mxu2 %v2924_v34 }
  0x1a   :  { %v2907_v40 = vld [vmem:[#allocation2 + $0x280] sm:$0xf]  ;;  %v3947_v41 = vld [vmem:[#allocation2 + $0x28c] sm:$0xf0]  ;;  %v2780_v45 = vor.u32 %v3915_v39, %v2779_v37  ;;  %1670 = vmatpush.bf16.msra.mxu3 %v3052_v38 }
  0x1b   :  { %v3035_v42 = vld [vmem:[#allocation2 + $0x380] sm:$0xf]  ;;  %v3979_v43 = vld [vmem:[#allocation2 + $0x38c] sm:$0xf0]  ;;  %v2908_v46 = vor.u32 %v3947_v41, %v2907_v40  ;;  %1632 = vmatpush.bf16.msra.mxu0 %v2652_v44 }
  0x1c   :  { %v2635_v47 = vld [vmem:[#allocation2 + $0x60] sm:$0xf]  ;;  %v3879_v48 = vld [vmem:[#allocation2 + $0x6c] sm:$0xf0]  ;;  %v3036_v50 = vor.u32 %v3979_v43, %v3035_v42  ;;  %1645 = vmatpush.bf16.msra.mxu1 %v2780_v45 }
  0x1d   :  { %v2763_v49 = vld [vmem:[#allocation2 + $0x160] sm:$0xf]  ;;  %v3911_v51 = vld [vmem:[#allocation2 + $0x16c] sm:$0xf0]  ;;  %v2636_v56 = vor.u32 %v3879_v48, %v2635_v47  ;;  %1658 = vmatpush.bf16.msra.mxu2 %v2908_v46 }
  0x1e   :  { %v2891_v52 = vld [vmem:[#allocation2 + $0x260] sm:$0xf]  ;;  %v3943_v53 = vld [vmem:[#allocation2 + $0x26c] sm:$0xf0]  ;;  %v2764_v57 = vor.u32 %v3911_v51, %v2763_v49  ;;  %1671 = vmatpush.bf16.msra.mxu3 %v3036_v50 }
  0x1f   :  { %v3019_v54 = vld [vmem:[#allocation2 + $0x360] sm:$0xf]  ;;  %v3975_v55 = vld [vmem:[#allocation2 + $0x36c] sm:$0xf0]  ;;  %v2892_v58 = vor.u32 %v3943_v53, %v2891_v52  ;;  %1633 = vmatpush.bf16.msra.mxu0 %v2636_v56 }
  0x20   :  { %v2619_v59 = vld [vmem:[#allocation2 + $0x40] sm:$0xf]  ;;  %v3875_v60 = vld [vmem:[#allocation2 + $0x4c] sm:$0xf0]  ;;  %v3020_v62 = vor.u32 %v3975_v55, %v3019_v54  ;;  %1646 = vmatpush.bf16.msra.mxu1 %v2764_v57 }
  0x21   :  { %v2747_v61 = vld [vmem:[#allocation2 + $0x140] sm:$0xf]  ;;  %v3907_v63 = vld [vmem:[#allocation2 + $0x14c] sm:$0xf0]  ;;  %v2620_v4 = vor.u32 %v3875_v60, %v2619_v59  ;;  %1659 = vmatpush.bf16.msra.mxu2 %v2892_v58  ;;  %v49_v59 = vld [vmem:[%s4390_s0] sm:$0xff] }
  0x22   :  { %v2875_v0 = vld [vmem:[#allocation2 + $0x240] sm:$0xf]  ;;  %v3939_v1 = vld [vmem:[#allocation2 + $0x24c] sm:$0xf0]  ;;  %v2748_v5 = vor.u32 %v3907_v63, %v2747_v61  ;;  %1672 = vmatpush.bf16.msra.mxu3 %v3020_v62  ;;  %57 = vst [vmem:[#allocation1] ss:$4 sm:$0xff] %v49_v59 }
  0x23   :  { %v3003_v2 = vld [vmem:[#allocation2 + $0x340] sm:$0xf]  ;;  %v3971_v3 = vld [vmem:[#allocation2 + $0x34c] sm:$0xf0]  ;;  %v2876_v6 = vor.u32 %v3939_v1, %v2875_v0  ;;  %1634 = vmatpush.bf16.msra.mxu0 %v2620_v4 }
  0x24   :  { %v2603_v7 = vld [vmem:[#allocation2 + $0x20] sm:$0xf]  ;;  %v3871_v8 = vld [vmem:[#allocation2 + $0x2c] sm:$0xf0]  ;;  %v3004_v10 = vor.u32 %v3971_v3, %v3003_v2  ;;  %1647 = vmatpush.bf16.msra.mxu1 %v2748_v5 }
  0x25   :  { %v2731_v9 = vld [vmem:[#allocation2 + $0x120] sm:$0xf]  ;;  %v3903_v11 = vld [vmem:[#allocation2 + $0x12c] sm:$0xf0]  ;;  %v2604_v16 = vor.u32 %v3871_v8, %v2603_v7  ;;  %1660 = vmatpush.bf16.msra.mxu2 %v2876_v6 }
  0x26   :  { %v2859_v12 = vld [vmem:[#allocation2 + $0x220] sm:$0xf]  ;;  %v3935_v13 = vld [vmem:[#allocation2 + $0x22c] sm:$0xf0]  ;;  %v2732_v19 = vor.u32 %v3903_v11, %v2731_v9  ;;  %1673 = vmatpush.bf16.msra.mxu3 %v3004_v10 }
  0x27   :  { %v2987_v14 = vld [vmem:[#allocation2 + $0x320] sm:$0xf]  ;;  %v3967_v15 = vld [vmem:[#allocation2 + $0x32c] sm:$0xf0]  ;;  %v2860_v20 = vor.u32 %v3935_v13, %v2859_v12  ;;  %1635 = vmatpush.bf16.msra.mxu0 %v2604_v16 }
  0x28   :  { %v2587_v17 = vld [vmem:[#allocation2] sm:$0xf]  ;;  %v3867_v18 = vld [vmem:[#allocation2 + $0xc] sm:$0xf0]  ;;  %v2988_v24 = vor.u32 %v3967_v15, %v2987_v14  ;;  %1648 = vmatpush.bf16.msra.mxu1 %v2732_v19 }
  0x29   :  { %v2715_v21 = vld [vmem:[#allocation2 + $0x100] sm:$0xf]  ;;  %v3899_v22 = vld [vmem:[#allocation2 + $0x10c] sm:$0xf0]  ;;  %v2588_v31 = vor.u32 %v3867_v18, %v2587_v17  ;;  %1661 = vmatpush.bf16.msra.mxu2 %v2860_v20 }
  0x2a   :  { %v2843_v23 = vld [vmem:[#allocation2 + $0x200] sm:$0xf]  ;;  %v3931_v25 = vld [vmem:[#allocation2 + $0x20c] sm:$0xf0]  ;;  %v2716_v35 = vor.u32 %v3899_v22, %v2715_v21  ;;  %1674 = vmatpush.bf16.msra.mxu3 %v2988_v24 }
  0x2b   :  { %v2971_v26 = vld [vmem:[#allocation2 + $0x300] sm:$0xf]  ;;  %v3963_v27 = vld [vmem:[#allocation2 + $0x30c] sm:$0xf0]  ;;  %v2844_v36 = vor.u32 %v3931_v25, %v2843_v23  ;;  %1636 = vmatpush.bf16.msra.mxu0 %v2588_v31 }
  0x2c   :  { %v3211_v28 = vld [vmem:[#allocation2 + $0x4e0] sm:$0xf]  ;;  %v4023_v29 = vld [vmem:[#allocation2 + $0x4ec] sm:$0xf0]  ;;  %v2972_v39 = vor.u32 %v3963_v27, %v2971_v26  ;;  %1649 = vmatpush.bf16.msra.mxu1 %v2716_v35 }
  0x2d   :  { %v3339_v30 = vld [vmem:[#allocation2 + $0x5e0] sm:$0xf]  ;;  %v4055_v32 = vld [vmem:[#allocation2 + $0x5ec] sm:$0xf0]  ;;  %v3212_v40 = vor.u32 %v4023_v29, %v3211_v28  ;;  %1662 = vmatpush.bf16.msra.mxu2 %v2844_v36 }
  0x2e   :  { %v3467_v33 = vld [vmem:[#allocation2 + $0x6e0] sm:$0xf]  ;;  %v4087_v34 = vld [vmem:[#allocation2 + $0x6ec] sm:$0xf0]  ;;  %v3340_v41 = vor.u32 %v4055_v32, %v3339_v30  ;;  %1675 = vmatpush.bf16.msra.mxu3 %v2972_v39 }
  0x2f   :  { %v3595_v37 = vld [vmem:[#allocation2 + $0x7e0] sm:$0xf]  ;;  %v4119_v38 = vld [vmem:[#allocation2 + $0x7ec] sm:$0xf0]  ;;  %v3468_v42 = vor.u32 %v4087_v34, %v3467_v33  ;;  %1681 = vmatpush.bf16.msrb.mxu0 %v3212_v40 }
  0x30   :  { %v3195_v43 = vld [vmem:[#allocation2 + $0x4c0] sm:$0xf]  ;;  %v4019_v44 = vld [vmem:[#allocation2 + $0x4cc] sm:$0xf0]  ;;  %v3596_v46 = vor.u32 %v4119_v38, %v3595_v37  ;;  %1694 = vmatpush.bf16.msrb.mxu1 %v3340_v41 }
  0x31   :  { %v3323_v45 = vld [vmem:[#allocation2 + $0x5c0] sm:$0xf]  ;;  %v4051_v47 = vld [vmem:[#allocation2 + $0x5cc] sm:$0xf0]  ;;  %v3196_v52 = vor.u32 %v4019_v44, %v3195_v43  ;;  %1707 = vmatpush.bf16.msrb.mxu2 %v3468_v42 }
  0x32   :  { %v3451_v48 = vld [vmem:[#allocation2 + $0x6c0] sm:$0xf]  ;;  %v4083_v49 = vld [vmem:[#allocation2 + $0x6cc] sm:$0xf0]  ;;  %v3324_v55 = vor.u32 %v4051_v47, %v3323_v45  ;;  %1720 = vmatpush.bf16.msrb.mxu3 %v3596_v46 }
  0x33   :  { %v3579_v50 = vld [vmem:[#allocation2 + $0x7c0] sm:$0xf]  ;;  %v4115_v51 = vld [vmem:[#allocation2 + $0x7cc] sm:$0xf0]  ;;  %v3452_v56 = vor.u32 %v4083_v49, %v3451_v48  ;;  %1682 = vmatpush.bf16.msrb.mxu0 %v3196_v52 }
  0x34   :  { %v3179_v53 = vld [vmem:[#allocation2 + $0x4a0] sm:$0xf]  ;;  %v4015_v54 = vld [vmem:[#allocation2 + $0x4ac] sm:$0xf0]  ;;  %v3580_v60 = vor.u32 %v4115_v51, %v3579_v50  ;;  %1695 = vmatpush.bf16.msrb.mxu1 %v3324_v55 }
  0x35   :  { %v3307_v57 = vld [vmem:[#allocation2 + $0x5a0] sm:$0xf]  ;;  %v4047_v58 = vld [vmem:[#allocation2 + $0x5ac] sm:$0xf0]  ;;  %v3180_v1 = vor.u32 %v4015_v54, %v3179_v53  ;;  %1708 = vmatpush.bf16.msrb.mxu2 %v3452_v56 }
  0x36   :  { %v3435_v61 = vld [vmem:[#allocation2 + $0x6a0] sm:$0xf]  ;;  %v4079_v62 = vld [vmem:[#allocation2 + $0x6ac] sm:$0xf0]  ;;  %v3308_v3 = vor.u32 %v4047_v58, %v3307_v57  ;;  %1721 = vmatpush.bf16.msrb.mxu3 %v3580_v60 }
  0x37   :  { %v3563_v63 = vld [vmem:[#allocation2 + $0x7a0] sm:$0xf]  ;;  %v4111_v0 = vld [vmem:[#allocation2 + $0x7ac] sm:$0xf0]  ;;  %v3436_v4 = vor.u32 %v4079_v62, %v3435_v61  ;;  %1683 = vmatpush.bf16.msrb.mxu0 %v3180_v1 }
  0x38   :  { %v3163_v2 = vld [vmem:[#allocation2 + $0x480] sm:$0xf]  ;;  %v4011_v5 = vld [vmem:[#allocation2 + $0x48c] sm:$0xf0]  ;;  %v3564_v8 = vor.u32 %v4111_v0, %v3563_v63  ;;  %1696 = vmatpush.bf16.msrb.mxu1 %v3308_v3 }
  0x39   :  { %v3291_v6 = vld [vmem:[#allocation2 + $0x580] sm:$0xf]  ;;  %v4043_v7 = vld [vmem:[#allocation2 + $0x58c] sm:$0xf0]  ;;  %v3164_v15 = vor.u32 %v4011_v5, %v3163_v2  ;;  %1709 = vmatpush.bf16.msrb.mxu2 %v3436_v4 }
  0x3a   :  { %v3419_v9 = vld [vmem:[#allocation2 + $0x680] sm:$0xf]  ;;  %v4075_v10 = vld [vmem:[#allocation2 + $0x68c] sm:$0xf0]  ;;  %v3292_v20 = vor.u32 %v4043_v7, %v3291_v6  ;;  %1722 = vmatpush.bf16.msrb.mxu3 %v3564_v8  ;;  %v3893_v6 = vld [vmem:[#allocation2 + $0xe4] sm:$0xf] }
  0x3b   :  { %v3547_v11 = vld [vmem:[#allocation2 + $0x780] sm:$0xf]  ;;  %v4107_v12 = vld [vmem:[#allocation2 + $0x78c] sm:$0xf0]  ;;  %v3420_v21 = vor.u32 %v4075_v10, %v3419_v9  ;;  %1684 = vmatpush.bf16.msrb.mxu0 %v3164_v15  ;;  %v2701_v7 = vld [vmem:[#allocation2 + $0xf0] sm:$0xf0] }
  0x3c   :  { %v3147_v13 = vld [vmem:[#allocation2 + $0x460] sm:$0xf]  ;;  %v4007_v14 = vld [vmem:[#allocation2 + $0x46c] sm:$0xf0]  ;;  %v3548_v24 = vor.u32 %v4107_v12, %v3547_v11  ;;  %1697 = vmatpush.bf16.msrb.mxu1 %v3292_v20  ;;  %v3925_v8 = vld [vmem:[#allocation2 + $0x1e4] sm:$0xf] }
  0x3d   :  { %v3275_v16 = vld [vmem:[#allocation2 + $0x560] sm:$0xf]  ;;  %v4039_v17 = vld [vmem:[#allocation2 + $0x56c] sm:$0xf0]  ;;  %v3148_v33 = vor.u32 %v4007_v14, %v3147_v13  ;;  %1710 = vmatpush.bf16.msrb.mxu2 %v3420_v21  ;;  %v2829_v9 = vld [vmem:[#allocation2 + $0x1f0] sm:$0xf0]  ;;  %v2704_v21 = vor.u32 %v3893_v6, %v2701_v7 }
  0x3e   :  { %v3403_v18 = vld [vmem:[#allocation2 + $0x660] sm:$0xf]  ;;  %v4071_v19 = vld [vmem:[#allocation2 + $0x66c] sm:$0xf0]  ;;  %v3276_v34 = vor.u32 %v4039_v17, %v3275_v16  ;;  %1723 = vmatpush.bf16.msrb.mxu3 %v3548_v24  ;;  %v3957_v10 = vld [vmem:[#allocation2 + $0x2e4] sm:$0xf]  ;;  %v2832_v24 = vor.u32 %v3925_v8, %v2829_v9 }
  0x3f   :  { %v62_v22 = vld.sshfl [vmem:[#allocation1 + $0x10] sm:$0xff pattern:$0x73625140]  ;;  %v60_v23 = vld.sshfl [vmem:[#allocation1] sm:$0xff pattern:$0x73625140]  ;;  %v3404_v35 = vor.u32 %v4071_v19, %v3403_v18  ;;  %1685 = vmatpush.bf16.msrb.mxu0 %v3148_v33 }
  0x40   :  { %v4285_v25 = vpack.c.bf16 %v62_v22, %v62_v22  ;;  %v4287_v26 = vpack.c.bf16 %v60_v23, %v60_v23  ;;  %v63_v27 = vld.sshfl [vmem:[#allocation1 + $0x18] sm:$0xff pattern:$0x73625140]  ;;  %v61_v28 = vld.sshfl [vmem:[#allocation1 + $0x8] sm:$0xff pattern:$0x73625140]  ;;  %1698 = vmatpush.bf16.msrb.mxu1 %v3276_v34 }
  0x41   :  { %v3531_v29 = vld [vmem:[#allocation2 + $0x760] sm:$0xf]  ;;  %v4103_v30 = vld [vmem:[#allocation2 + $0x76c] sm:$0xf0]  ;;  %v4289_v31 = vpack.c.bf16 %v63_v27, %v63_v27  ;;  %v4291_v32 = vpack.c.bf16 %v61_v28, %v61_v28  ;;  %1711 = vmatpush.bf16.msrb.mxu2 %v3404_v35  ;;  %v2957_v12 = vld [vmem:[#allocation2 + $0x2f0] sm:$0xf0] }
  0x42   :  { %1663 = vmatmul.bf16.vlgmr.msra.gmra.mxu2 %v4285_v25  ;;  %v3131_v36 = vld [vmem:[#allocation2 + $0x440] sm:$0xf]  ;;  %v4003_v37 = vld [vmem:[#allocation2 + $0x44c] sm:$0xf0]  ;;  %v3532_v39 = vor.u32 %v4103_v30, %v3531_v29  ;;  %1637 = vmatmul.bf16.vlgmr.msra.gmra.mxu0 %v4287_v26  ;;  %v3989_v13 = vld [vmem:[#allocation2 + $0x3e4] sm:$0xf]  ;;  %v2960_v27 = vor.u32 %v3957_v10, %v2957_v12 }
  0x43   :  { %v3259_v38 = vld [vmem:[#allocation2 + $0x540] sm:$0xf]  ;;  %v4035_v40 = vld [vmem:[#allocation2 + $0x54c] sm:$0xf0]  ;;  %1676 = vmatmul.bf16.vlgmr.msra.gmra.mxu3 %v4289_v31  ;;  %1650 = vmatmul.bf16.vlgmr.msra.gmra.mxu1 %v4291_v32  ;;  %v3132_v45 = vor.u32 %v4003_v37, %v3131_v36  ;;  %v3085_v14 = vld [vmem:[#allocation2 + $0x3f0] sm:$0xf0] }
  0x44   :  { %v3387_v41 = vld [vmem:[#allocation2 + $0x640] sm:$0xf]  ;;  %v4067_v42 = vld [vmem:[#allocation2 + $0x64c] sm:$0xf0]  ;;  %v3260_v48 = vor.u32 %v4035_v40, %v3259_v38  ;;  %1724 = vmatpush.bf16.msrb.mxu3 %v3532_v39  ;;  %v3889_v17 = vld [vmem:[#allocation2 + $0xc4] sm:$0xf]  ;;  %v3088_v30 = vor.u32 %v3989_v13, %v3085_v14 }
  0x45   :  { %v3515_v43 = vld [vmem:[#allocation2 + $0x740] sm:$0xf]  ;;  %v4099_v44 = vld [vmem:[#allocation2 + $0x74c] sm:$0xf0]  ;;  %v3388_v49 = vor.u32 %v4067_v42, %v3387_v41  ;;  %1686 = vmatpush.bf16.msrb.mxu0 %v3132_v45  ;;  %v2685_v18 = vld [vmem:[#allocation2 + $0xd0] sm:$0xf0] }
  0x46   :  { %v3115_v46 = vld [vmem:[#allocation2 + $0x420] sm:$0xf]  ;;  %v3999_v47 = vld [vmem:[#allocation2 + $0x42c] sm:$0xf0]  ;;  %v3516_v53 = vor.u32 %v4099_v44, %v3515_v43  ;;  %1699 = vmatpush.bf16.msrb.mxu1 %v3260_v48  ;;  %v3921_v28 = vld [vmem:[#allocation2 + $0x1c4] sm:$0xf]  ;;  %v2688_v41 = vor.u32 %v3889_v17, %v2685_v18 }
  0x47   :  { %v3243_v50 = vld [vmem:[#allocation2 + $0x520] sm:$0xf]  ;;  %v4031_v51 = vld [vmem:[#allocation2 + $0x52c] sm:$0xf0]  ;;  %v3116_v59 = vor.u32 %v3999_v47, %v3115_v46  ;;  %1712 = vmatpush.bf16.msrb.mxu2 %v3388_v49  ;;  %v2813_v33 = vld [vmem:[#allocation2 + $0x1d0] sm:$0xf0] }
  0x48   :  { %v50_v52 = vld [vmem:[%s4390_s0 + $0x8] sm:$0xff]  ;;  %v4063_v55 = vld [vmem:[#allocation2 + $0x62c] sm:$0xf0]  ;;  %v3244_v63 = vor.u32 %v4031_v51, %v3243_v50  ;;  %1725 = vmatpush.bf16.msrb.mxu3 %v3516_v53  ;;  %v2941_v35 = vld [vmem:[#allocation2 + $0x2d0] sm:$0xf0]  ;;  %v2816_v43 = vor.u32 %v3921_v28, %v2813_v33 }
  0x49   :  { %v3371_v54 = vld [vmem:[#allocation2 + $0x620] sm:$0xf]  ;;  %59 = vst [vmem:[#allocation1 + $0x20] ss:$4 sm:$0xff] %v50_v52  ;;  %v4095_v57 = vld [vmem:[#allocation2 + $0x72c] sm:$0xf0]  ;;  %1687 = vmatpush.bf16.msrb.mxu0 %v3116_v59 }
  0x4a   :  { %v3499_v56 = vld [vmem:[#allocation2 + $0x720] sm:$0xf]  ;;  %v3995_v60 = vld [vmem:[#allocation2 + $0x40c] sm:$0xf0]  ;;  %v3372_v0 = vor.u32 %v4063_v55, %v3371_v54  ;;  %1700 = vmatpush.bf16.msrb.mxu1 %v3244_v63  ;;  %v3953_v34 = vld [vmem:[#allocation2 + $0x2c4] sm:$0xf] }
  0x4b   :  { %v3099_v58 = vld [vmem:[#allocation2 + $0x400] sm:$0xf]  ;;  %v4027_v62 = vld [vmem:[#allocation2 + $0x50c] sm:$0xf0]  ;;  %v3500_v4 = vor.u32 %v4095_v57, %v3499_v56  ;;  %v3985_v37 = vld [vmem:[#allocation2 + $0x3c4] sm:$0xf]  ;;  %v2944_v44 = vor.u32 %v3953_v34, %v2941_v35 }
  0x4c   :  { %v3227_v61 = vld [vmem:[#allocation2 + $0x500] sm:$0xf]  ;;  %v4059_v2 = vld [vmem:[#allocation2 + $0x60c] sm:$0xf0]  ;;  %v3100_v11 = vor.u32 %v3995_v60, %v3099_v58  ;;  %1713 = vmatpush.bf16.msrb.mxu2 %v3372_v0  ;;  %v3069_v38 = vld [vmem:[#allocation2 + $0x3d0] sm:$0xf0] }
  0x4d   :  { %v3355_v1 = vld [vmem:[#allocation2 + $0x600] sm:$0xf]  ;;  %v4091_v5 = vld [vmem:[#allocation2 + $0x70c] sm:$0xf0]  ;;  %v3228_v15 = vor.u32 %v4027_v62, %v3227_v61  ;;  %1726 = vmatpush.bf16.msrb.mxu3 %v3500_v4  ;;  %v3885_v45 = vld [vmem:[#allocation2 + $0xa4] sm:$0xf]  ;;  %v3072_v48 = vor.u32 %v3985_v37, %v3069_v38 }
  0x4e   :  { %v3483_v3 = vld [vmem:[#allocation2 + $0x700] sm:$0xf]  ;;  %v3356_v16 = vor.u32 %v4059_v2, %v3355_v1  ;;  %1688 = vmatpush.bf16.msrb.mxu0 %v3100_v11  ;;  %v2669_v46 = vld [vmem:[#allocation2 + $0xb0] sm:$0xf0]  ;;  %v3917_v47 = vld [vmem:[#allocation2 + $0x1a4] sm:$0xf] }
  0x4f   :  { %v3484_v20 = vor.u32 %v4091_v5, %v3483_v3  ;;  %1701 = vmatpush.bf16.msrb.mxu1 %v3228_v15  ;;  %v2797_v49 = vld [vmem:[#allocation2 + $0x1b0] sm:$0xf0]  ;;  %v3949_v50 = vld [vmem:[#allocation2 + $0x2a4] sm:$0xf]  ;;  %v2672_v54 = vor.u32 %v3885_v45, %v2669_v46 }
  0x50   :  { %v66_v19 = vld.sshfl [vmem:[#allocation1 + $0x30] sm:$0xff pattern:$0x73625140]  ;;  %v64_v22 = vld.sshfl [vmem:[#allocation1 + $0x20] sm:$0xff pattern:$0x73625140]  ;;  %1714 = vmatpush.bf16.msrb.mxu2 %v3356_v16  ;;  %v2800_v55 = vor.u32 %v3917_v47, %v2797_v49 }
  0x51   :  { %v67_v23 = vld.sshfl [vmem:[#allocation1 + $0x38] sm:$0xff pattern:$0x73625140]  ;;  %v65_v29 = vld.sshfl [vmem:[#allocation1 + $0x28] sm:$0xff pattern:$0x73625140]  ;;  %v4300_v36 = vpack.c.bf16 %v66_v19, %v66_v19  ;;  %v4302_v39 = vpack.c.bf16 %v64_v22, %v64_v22  ;;  %1727 = vmatpush.bf16.msrb.mxu3 %v3484_v20 }
  0x52   :  { %v4304_v40 = vpack.c.bf16 %v67_v23, %v67_v23  ;;  %1733 = vmatpush.bf16.msra.mxu0 %v2704_v21  ;;  %v4306_v42 = vpack.c.bf16 %v65_v29, %v65_v29  ;;  %v2925_v51 = vld [vmem:[#allocation2 + $0x2b0] sm:$0xf0]  ;;  %v3981_v52 = vld [vmem:[#allocation2 + $0x3a4] sm:$0xf] }
  0x53   :  { %1746 = vmatpush.bf16.msra.mxu1 %v2832_v24  ;;  %1715 = vmatmul.bf16.vlgmr.msrb.gmra.mxu2 %v4300_v36  ;;  %v3053_v53 = vld [vmem:[#allocation2 + $0x3b0] sm:$0xf0]  ;;  %v2928_v56 = vor.u32 %v3949_v50, %v2925_v51  ;;  %v3881_v57 = vld [vmem:[#allocation2 + $0x84] sm:$0xf] }
  0x54   :  { %1759 = vmatpush.bf16.msra.mxu2 %v2960_v27  ;;  %1689 = vmatmul.bf16.vlgmr.msrb.gmra.mxu0 %v4302_v39  ;;  %v2653_v58 = vld [vmem:[#allocation2 + $0x90] sm:$0xf0]  ;;  %v3913_v59 = vld [vmem:[#allocation2 + $0x184] sm:$0xf]  ;;  %v3056_v60 = vor.u32 %v3981_v52, %v3053_v53 }
  0x55   :  { %1772 = vmatpush.bf16.msra.mxu3 %v3088_v30  ;;  %1702 = vmatmul.bf16.vlgmr.msrb.gmra.mxu1 %v4306_v42  ;;  %v2781_v61 = vld [vmem:[#allocation2 + $0x190] sm:$0xf0]  ;;  %v3945_v62 = vld [vmem:[#allocation2 + $0x284] sm:$0xf]  ;;  %v2656_v2 = vor.u32 %v3881_v57, %v2653_v58 }
  0x56   :  { %1728 = vmatmul.bf16.vlgmr.msrb.gmra.mxu3 %v4304_v40  ;;  %1734 = vmatpush.bf16.msra.mxu0 %v2688_v41  ;;  %v2909_v63 = vld [vmem:[#allocation2 + $0x290] sm:$0xf0]  ;;  %v3977_v0 = vld [vmem:[#allocation2 + $0x384] sm:$0xf]  ;;  %v2784_v3 = vor.u32 %v3913_v59, %v2781_v61 }
  0x57   :  { %1747 = vmatpush.bf16.msra.mxu1 %v2816_v43  ;;  %v3037_v1 = vld [vmem:[#allocation2 + $0x390] sm:$0xf0]  ;;  %v2912_v4 = vor.u32 %v3945_v62, %v2909_v63  ;;  %v3877_v5 = vld [vmem:[#allocation2 + $0x64] sm:$0xf] }
  0x58   :  { %1760 = vmatpush.bf16.msra.mxu2 %v2944_v44  ;;  %v2637_v6 = vld [vmem:[#allocation2 + $0x70] sm:$0xf0]  ;;  %v3909_v7 = vld [vmem:[#allocation2 + $0x164] sm:$0xf]  ;;  %v3040_v8 = vor.u32 %v3977_v0, %v3037_v1 }
  0x59   :  { %1773 = vmatpush.bf16.msra.mxu3 %v3072_v48  ;;  %v2765_v9 = vld [vmem:[#allocation2 + $0x170] sm:$0xf0]  ;;  %v3941_v10 = vld [vmem:[#allocation2 + $0x264] sm:$0xf]  ;;  %v2640_v14 = vor.u32 %v3877_v5, %v2637_v6 }
  0x5a   :  { %1735 = vmatpush.bf16.msra.mxu0 %v2672_v54  ;;  %v2893_v11 = vld [vmem:[#allocation2 + $0x270] sm:$0xf0]  ;;  %v3973_v12 = vld [vmem:[#allocation2 + $0x364] sm:$0xf]  ;;  %v2768_v15 = vor.u32 %v3909_v7, %v2765_v9 }
  0x5b   :  { %1748 = vmatpush.bf16.msra.mxu1 %v2800_v55  ;;  %v3021_v13 = vld [vmem:[#allocation2 + $0x370] sm:$0xf0]  ;;  %v2896_v16 = vor.u32 %v3941_v10, %v2893_v11  ;;  %v3873_v17 = vld [vmem:[#allocation2 + $0x44] sm:$0xf] }
  0x5c   :  { %1761 = vmatpush.bf16.msra.mxu2 %v2928_v56  ;;  %v2621_v18 = vld [vmem:[#allocation2 + $0x50] sm:$0xf0]  ;;  %v3905_v19 = vld [vmem:[#allocation2 + $0x144] sm:$0xf]  ;;  %v3024_v20 = vor.u32 %v3973_v12, %v3021_v13 }
  0x5d   :  { %1774 = vmatpush.bf16.msra.mxu3 %v3056_v60  ;;  %v2749_v21 = vld [vmem:[#allocation2 + $0x150] sm:$0xf0]  ;;  %v3937_v22 = vld [vmem:[#allocation2 + $0x244] sm:$0xf]  ;;  %v2624_v28 = vor.u32 %v3873_v17, %v2621_v18 }
  0x5e   :  { %1736 = vmatpush.bf16.msra.mxu0 %v2656_v2  ;;  %v2877_v23 = vld [vmem:[#allocation2 + $0x250] sm:$0xf0]  ;;  %v3969_v24 = vld [vmem:[#allocation2 + $0x344] sm:$0xf]  ;;  %v2752_v29 = vor.u32 %v3905_v19, %v2749_v21 }
  0x5f   :  { %1749 = vmatpush.bf16.msra.mxu1 %v2784_v3  ;;  %v3005_v27 = vld [vmem:[#allocation2 + $0x350] sm:$0xf0]  ;;  %v2880_v30 = vor.u32 %v3937_v22, %v2877_v23  ;;  %v3869_v33 = vld [vmem:[#allocation2 + $0x24] sm:$0xf] }
  0x60   :  { %1762 = vmatpush.bf16.msra.mxu2 %v2912_v4  ;;  %v2605_v34 = vld [vmem:[#allocation2 + $0x30] sm:$0xf0]  ;;  %v3901_v35 = vld [vmem:[#allocation2 + $0x124] sm:$0xf]  ;;  %v3008_v37 = vor.u32 %v3969_v24, %v3005_v27 }
  0x61   :  { %1775 = vmatpush.bf16.msra.mxu3 %v3040_v8  ;;  %v2733_v38 = vld [vmem:[#allocation2 + $0x130] sm:$0xf0]  ;;  %v3933_v41 = vld [vmem:[#allocation2 + $0x224] sm:$0xf]  ;;  %v2608_v46 = vor.u32 %v3869_v33, %v2605_v34 }
  0x62   :  { %1737 = vmatpush.bf16.msra.mxu0 %v2640_v14  ;;  %v2861_v43 = vld [vmem:[#allocation2 + $0x230] sm:$0xf0]  ;;  %v3965_v44 = vld [vmem:[#allocation2 + $0x324] sm:$0xf]  ;;  %v2736_v49 = vor.u32 %v3901_v35, %v2733_v38 }
  0x63   :  { %1750 = vmatpush.bf16.msra.mxu1 %v2768_v15  ;;  %v2989_v45 = vld [vmem:[#allocation2 + $0x330] sm:$0xf0]  ;;  %v3865_v47 = vld [vmem:[#allocation2 + $0x4] sm:$0xf]  ;;  %v2864_v50 = vor.u32 %v3933_v41, %v2861_v43 }
  0x64   :  { %1763 = vmatpush.bf16.msra.mxu2 %v2896_v16  ;;  %v2589_v48 = vld [vmem:[#allocation2 + $0x10] sm:$0xf0]  ;;  %v3897_v51 = vld [vmem:[#allocation2 + $0x104] sm:$0xf]  ;;  %v2992_v54 = vor.u32 %v3965_v44, %v2989_v45 }
  0x65   :  { %1776 = vmatpush.bf16.msra.mxu3 %v3024_v20  ;;  %v2717_v52 = vld [vmem:[#allocation2 + $0x110] sm:$0xf0]  ;;  %v3929_v53 = vld [vmem:[#allocation2 + $0x204] sm:$0xf]  ;;  %v2592_v61 = vor.u32 %v3865_v47, %v2589_v48 }
  0x66   :  { %1738 = vmatpush.bf16.msra.mxu0 %v2624_v28  ;;  %v2845_v55 = vld [vmem:[#allocation2 + $0x210] sm:$0xf0]  ;;  %v3961_v56 = vld [vmem:[#allocation2 + $0x304] sm:$0xf]  ;;  %v2720_v1 = vor.u32 %v3897_v51, %v2717_v52 }
  0x67   :  { %1751 = vmatpush.bf16.msra.mxu1 %v2752_v29  ;;  %v2973_v57 = vld [vmem:[#allocation2 + $0x310] sm:$0xf0]  ;;  %v4021_v58 = vld [vmem:[#allocation2 + $0x4e4] sm:$0xf]  ;;  %v2848_v2 = vor.u32 %v3929_v53, %v2845_v55 }
  0x68   :  { %1764 = vmatpush.bf16.msra.mxu2 %v2880_v30  ;;  %v3213_v59 = vld [vmem:[#allocation2 + $0x4f0] sm:$0xf0]  ;;  %v4053_v60 = vld [vmem:[#allocation2 + $0x5e4] sm:$0xf]  ;;  %v2976_v5 = vor.u32 %v3961_v56, %v2973_v57 }
  0x69   :  { %1777 = vmatpush.bf16.msra.mxu3 %v3008_v37  ;;  %v3341_v62 = vld [vmem:[#allocation2 + $0x5f0] sm:$0xf0]  ;;  %v4085_v63 = vld [vmem:[#allocation2 + $0x6e4] sm:$0xf]  ;;  %v3216_v6 = vor.u32 %v4021_v58, %v3213_v59 }
  0x6a   :  { %1739 = vmatpush.bf16.msra.mxu0 %v2608_v46  ;;  %v3469_v0 = vld [vmem:[#allocation2 + $0x6f0] sm:$0xf0]  ;;  %v4117_v3 = vld [vmem:[#allocation2 + $0x7e4] sm:$0xf]  ;;  %v3344_v7 = vor.u32 %v4053_v60, %v3341_v62 }
  0x6b   :  { %1752 = vmatpush.bf16.msra.mxu1 %v2736_v49  ;;  %v3597_v4 = vld [vmem:[#allocation2 + $0x7f0] sm:$0xf0]  ;;  %v3472_v8 = vor.u32 %v4085_v63, %v3469_v0  ;;  %v4017_v9 = vld [vmem:[#allocation2 + $0x4c4] sm:$0xf] }
  0x6c   :  { %1765 = vmatpush.bf16.msra.mxu2 %v2864_v50  ;;  %v3197_v10 = vld [vmem:[#allocation2 + $0x4d0] sm:$0xf0]  ;;  %v4049_v11 = vld [vmem:[#allocation2 + $0x5c4] sm:$0xf]  ;;  %v3600_v12 = vor.u32 %v4117_v3, %v3597_v4 }
  0x6d   :  { %1778 = vmatpush.bf16.msra.mxu3 %v2992_v54  ;;  %v3325_v13 = vld [vmem:[#allocation2 + $0x5d0] sm:$0xf0]  ;;  %v4081_v14 = vld [vmem:[#allocation2 + $0x6c4] sm:$0xf]  ;;  %v3200_v18 = vor.u32 %v4017_v9, %v3197_v10 }
  0x6e   :  { %1740 = vmatpush.bf16.msra.mxu0 %v2592_v61  ;;  %v3453_v15 = vld [vmem:[#allocation2 + $0x6d0] sm:$0xf0]  ;;  %v4113_v16 = vld [vmem:[#allocation2 + $0x7c4] sm:$0xf]  ;;  %v3328_v19 = vor.u32 %v4049_v11, %v3325_v13 }
  0x6f   :  { %1753 = vmatpush.bf16.msra.mxu1 %v2720_v1  ;;  %v3581_v17 = vld [vmem:[#allocation2 + $0x7d0] sm:$0xf0]  ;;  %v3456_v20 = vor.u32 %v4081_v14, %v3453_v15  ;;  %v4013_v21 = vld [vmem:[#allocation2 + $0x4a4] sm:$0xf] }
  0x70   :  { %1766 = vmatpush.bf16.msra.mxu2 %v2848_v2  ;;  %v3181_v22 = vld [vmem:[#allocation2 + $0x4b0] sm:$0xf0]  ;;  %v4045_v23 = vld [vmem:[#allocation2 + $0x5a4] sm:$0xf]  ;;  %v3584_v24 = vor.u32 %v4113_v16, %v3581_v17 }
  0x71   :  { %1779 = vmatpush.bf16.msra.mxu3 %v2976_v5  ;;  %v3309_v27 = vld [vmem:[#allocation2 + $0x5b0] sm:$0xf0]  ;;  %v4077_v28 = vld [vmem:[#allocation2 + $0x6a4] sm:$0xf]  ;;  %1741 = vmatmul.bf16.vlgmr.msra.gmra.mxu0 %v4287_v26  ;;  %v3184_v34 = vor.u32 %v4013_v21, %v3181_v22 }
  0x72   :  { %1785 = vmatpush.bf16.msrb.mxu0 %v3216_v6  ;;  %v3437_v29 = vld [vmem:[#allocation2 + $0x6b0] sm:$0xf0]  ;;  %v4109_v30 = vld [vmem:[#allocation2 + $0x7a4] sm:$0xf]  ;;  %1754 = vmatmul.bf16.vlgmr.msra.gmra.mxu1 %v4291_v32  ;;  %v3312_v35 = vor.u32 %v4045_v23, %v3309_v27 }
  0x73   :  { %1798 = vmatpush.bf16.msrb.mxu1 %v3344_v7  ;;  %1767 = vmatmul.bf16.vlgmr.msra.gmra.mxu2 %v4285_v25  ;;  %v3565_v33 = vld [vmem:[#allocation2 + $0x7b0] sm:$0xf0]  ;;  %v3440_v37 = vor.u32 %v4077_v28, %v3437_v29  ;;  %v4009_v38 = vld [vmem:[#allocation2 + $0x484] sm:$0xf] }
  0x74   :  { %1811 = vmatpush.bf16.msrb.mxu2 %v3472_v8  ;;  %1780 = vmatmul.bf16.vlgmr.msra.gmra.mxu3 %v4289_v31  ;;  %v3165_v41 = vld [vmem:[#allocation2 + $0x490] sm:$0xf0]  ;;  %v4041_v43 = vld [vmem:[#allocation2 + $0x584] sm:$0xf]  ;;  %v3568_v44 = vor.u32 %v4109_v30, %v3565_v33 }
  0x75   :  { %1824 = vmatpush.bf16.msrb.mxu3 %v3600_v12  ;;  %v3293_v45 = vld [vmem:[#allocation2 + $0x590] sm:$0xf0]  ;;  %v4073_v46 = vld [vmem:[#allocation2 + $0x684] sm:$0xf]  ;;  %v3168_v50 = vor.u32 %v4009_v38, %v3165_v41  ;;  %v2707_v41 = vld [vmem:[#allocation2 + $0xe8] sm:$0xf] }
  0x76   :  { %1786 = vmatpush.bf16.msrb.mxu0 %v3200_v18  ;;  %v3421_v47 = vld [vmem:[#allocation2 + $0x690] sm:$0xf0]  ;;  %v4105_v48 = vld [vmem:[#allocation2 + $0x784] sm:$0xf]  ;;  %v3296_v51 = vor.u32 %v4041_v43, %v3293_v45  ;;  %v3896_v43 = vld [vmem:[#allocation2 + $0xf4] sm:$0xf0] }
  0x77   :  { %1799 = vmatpush.bf16.msrb.mxu1 %v3328_v19  ;;  %v3549_v49 = vld [vmem:[#allocation2 + $0x790] sm:$0xf0]  ;;  %v3424_v52 = vor.u32 %v4073_v46, %v3421_v47  ;;  %v4005_v53 = vld [vmem:[#allocation2 + $0x464] sm:$0xf]  ;;  %v3928_v46 = vld [vmem:[#allocation2 + $0x1f4] sm:$0xf0] }
  0x78   :  { %1812 = vmatpush.bf16.msrb.mxu2 %v3456_v20  ;;  %v3149_v54 = vld [vmem:[#allocation2 + $0x470] sm:$0xf0]  ;;  %v4037_v55 = vld [vmem:[#allocation2 + $0x564] sm:$0xf]  ;;  %v3552_v56 = vor.u32 %v4105_v48, %v3549_v49  ;;  %v2963_v47 = vld [vmem:[#allocation2 + $0x2e8] sm:$0xf] }
  0x79   :  { %1825 = vmatpush.bf16.msrb.mxu3 %v3584_v24  ;;  %v3277_v57 = vld [vmem:[#allocation2 + $0x570] sm:$0xf0]  ;;  %v4069_v58 = vld [vmem:[#allocation2 + $0x664] sm:$0xf]  ;;  %v3152_v62 = vor.u32 %v4005_v53, %v3149_v54  ;;  %v3960_v48 = vld [vmem:[#allocation2 + $0x2f4] sm:$0xf0]  ;;  %v2708_v54 = vor.u32 %v3896_v43, %v2707_v41 }
  0x7a   :  { %1787 = vmatpush.bf16.msrb.mxu0 %v3184_v34  ;;  %v3405_v59 = vld [vmem:[#allocation2 + $0x670] sm:$0xf0]  ;;  %v4101_v60 = vld [vmem:[#allocation2 + $0x764] sm:$0xf]  ;;  %v3280_v63 = vor.u32 %v4037_v55, %v3277_v57  ;;  %v2691_v57 = vld [vmem:[#allocation2 + $0xc8] sm:$0xf] }
  0x7b   :  { %1800 = vmatpush.bf16.msrb.mxu1 %v3312_v35  ;;  %v3533_v61 = vld [vmem:[#allocation2 + $0x770] sm:$0xf0]  ;;  %v3408_v0 = vor.u32 %v4069_v58, %v3405_v59  ;;  %v4001_v1 = vld [vmem:[#allocation2 + $0x444] sm:$0xf]  ;;  %v3892_v58 = vld [vmem:[#allocation2 + $0xd4] sm:$0xf0] }
  0x7c   :  { %1813 = vmatpush.bf16.msrb.mxu2 %v3440_v37  ;;  %v3133_v2 = vld [vmem:[#allocation2 + $0x450] sm:$0xf0]  ;;  %v4033_v3 = vld [vmem:[#allocation2 + $0x544] sm:$0xf]  ;;  %v3536_v4 = vor.u32 %v4101_v60, %v3533_v61  ;;  %v2819_v59 = vld [vmem:[#allocation2 + $0x1c8] sm:$0xf] }
  0x7d   :  { %1826 = vmatpush.bf16.msrb.mxu3 %v3568_v44  ;;  %v3261_v5 = vld [vmem:[#allocation2 + $0x550] sm:$0xf0]  ;;  %v4065_v6 = vld [vmem:[#allocation2 + $0x644] sm:$0xf]  ;;  %v3136_v10 = vor.u32 %v4001_v1, %v3133_v2  ;;  %v2835_v44 = vld [vmem:[#allocation2 + $0x1e8] sm:$0xf]  ;;  %v2692_v2 = vor.u32 %v3892_v58, %v2691_v57 }
  0x7e   :  { %1788 = vmatpush.bf16.msrb.mxu0 %v3168_v50  ;;  %v3389_v7 = vld [vmem:[#allocation2 + $0x650] sm:$0xf0]  ;;  %v4097_v8 = vld [vmem:[#allocation2 + $0x744] sm:$0xf]  ;;  %v3264_v11 = vor.u32 %v4033_v3, %v3261_v5  ;;  %v2836_v55 = vor.u32 %v3928_v46, %v2835_v44  ;;  %v3924_v61 = vld [vmem:[#allocation2 + $0x1d4] sm:$0xf0] }
  0x7f   :  { %1801 = vmatpush.bf16.msrb.mxu1 %v3296_v51  ;;  %v3517_v9 = vld [vmem:[#allocation2 + $0x750] sm:$0xf0]  ;;  %v3392_v12 = vor.u32 %v4065_v6, %v3389_v7  ;;  %v3997_v13 = vld [vmem:[#allocation2 + $0x424] sm:$0xf]  ;;  %v3091_v51 = vld [vmem:[#allocation2 + $0x3e8] sm:$0xf]  ;;  %v2820_v3 = vor.u32 %v3924_v61, %v2819_v59 }
  0x80   :  { %1814 = vmatpush.bf16.msrb.mxu2 %v3424_v52  ;;  %v3117_v14 = vld [vmem:[#allocation2 + $0x430] sm:$0xf0]  ;;  %v4029_v15 = vld [vmem:[#allocation2 + $0x524] sm:$0xf]  ;;  %v3520_v16 = vor.u32 %v4097_v8, %v3517_v9  ;;  %v3992_v52 = vld [vmem:[#allocation2 + $0x3f4] sm:$0xf0] }
  0x81   :  { %1827 = vmatpush.bf16.msrb.mxu3 %v3552_v56  ;;  %v3245_v17 = vld [vmem:[#allocation2 + $0x530] sm:$0xf0]  ;;  %v4061_v18 = vld [vmem:[#allocation2 + $0x624] sm:$0xf]  ;;  %v3120_v22 = vor.u32 %v3997_v13, %v3117_v14  ;;  %v2964_v56 = vor.u32 %v3960_v48, %v2963_v47  ;;  %v3092_v60 = vor.u32 %v3992_v52, %v3091_v51  ;;  %v3988_v1 = vld [vmem:[#allocation2 + $0x3d4] sm:$0xf0] }
  0x82   :  { %1789 = vmatpush.bf16.msrb.mxu0 %v3152_v62  ;;  %v3373_v19 = vld [vmem:[#allocation2 + $0x630] sm:$0xf0]  ;;  %v4093_v20 = vld [vmem:[#allocation2 + $0x724] sm:$0xf]  ;;  %v3248_v27 = vor.u32 %v4029_v15, %v3245_v17  ;;  %v2947_v62 = vld [vmem:[#allocation2 + $0x2c8] sm:$0xf] }
  0x83   :  { %1802 = vmatpush.bf16.msrb.mxu1 %v3280_v63  ;;  %v3501_v21 = vld [vmem:[#allocation2 + $0x730] sm:$0xf0]  ;;  %v3993_v23 = vld [vmem:[#allocation2 + $0x404] sm:$0xf]  ;;  %v3376_v28 = vor.u32 %v4061_v18, %v3373_v19  ;;  %v3956_v63 = vld [vmem:[#allocation2 + $0x2d4] sm:$0xf0] }
  0x84   :  { %1815 = vmatpush.bf16.msrb.mxu2 %v3408_v0  ;;  %v3101_v24 = vld [vmem:[#allocation2 + $0x410] sm:$0xf0]  ;;  %v4025_v29 = vld [vmem:[#allocation2 + $0x504] sm:$0xf]  ;;  %v3504_v34 = vor.u32 %v4093_v20, %v3501_v21  ;;  %v3075_v0 = vld [vmem:[#allocation2 + $0x3c8] sm:$0xf] }
  0x85   :  { %1828 = vmatpush.bf16.msrb.mxu3 %v3536_v4  ;;  %v3229_v30 = vld [vmem:[#allocation2 + $0x510] sm:$0xf0]  ;;  %v4057_v33 = vld [vmem:[#allocation2 + $0x604] sm:$0xf]  ;;  %v3104_v45 = vor.u32 %v3993_v23, %v3101_v24  ;;  %v2948_v4 = vor.u32 %v3956_v63, %v2947_v62  ;;  %v2675_v5 = vld [vmem:[#allocation2 + $0xa8] sm:$0xf]  ;;  %v3076_v8 = vor.u32 %v3988_v1, %v3075_v0 }
  0x86   :  { %1790 = vmatpush.bf16.msrb.mxu0 %v3136_v10  ;;  %v3357_v35 = vld [vmem:[#allocation2 + $0x610] sm:$0xf0]  ;;  %v4089_v37 = vld [vmem:[#allocation2 + $0x704] sm:$0xf]  ;;  %v3232_v49 = vor.u32 %v4025_v29, %v3229_v30  ;;  %v3888_v6 = vld [vmem:[#allocation2 + $0xb4] sm:$0xf0] }
  0x87   :  { %1803 = vmatpush.bf16.msrb.mxu1 %v3264_v11  ;;  %v3485_v38 = vld [vmem:[#allocation2 + $0x710] sm:$0xf0]  ;;  %v3360_v50 = vor.u32 %v4057_v33, %v3357_v35  ;;  %v2803_v7 = vld [vmem:[#allocation2 + $0x1a8] sm:$0xf]  ;;  %v3920_v9 = vld [vmem:[#allocation2 + $0x1b4] sm:$0xf0]  ;;  %v2676_v14 = vor.u32 %v3888_v6, %v2675_v5 }
  0x88   :  { %1816 = vmatpush.bf16.msrb.mxu2 %v3392_v12  ;;  %v3488_v53 = vor.u32 %v4089_v37, %v3485_v38  ;;  %v2931_v10 = vld [vmem:[#allocation2 + $0x2a8] sm:$0xf]  ;;  %v3952_v11 = vld [vmem:[#allocation2 + $0x2b4] sm:$0xf0]  ;;  %v2804_v15 = vor.u32 %v3920_v9, %v2803_v7 }
  0x89   :  { %1829 = vmatpush.bf16.msrb.mxu3 %v3520_v16  ;;  %v3059_v12 = vld [vmem:[#allocation2 + $0x3a8] sm:$0xf]  ;;  %v3984_v13 = vld [vmem:[#allocation2 + $0x3b4] sm:$0xf0]  ;;  %v2932_v16 = vor.u32 %v3952_v11, %v2931_v10 }
  0x8a   :  { %1791 = vmatpush.bf16.msrb.mxu0 %v3120_v22  ;;  %v2659_v17 = vld [vmem:[#allocation2 + $0x88] sm:$0xf]  ;;  %v3884_v18 = vld [vmem:[#allocation2 + $0x94] sm:$0xf0]  ;;  %v3060_v20 = vor.u32 %v3984_v13, %v3059_v12 }
  0x8b   :  { %1804 = vmatpush.bf16.msrb.mxu1 %v3248_v27  ;;  %v2787_v19 = vld [vmem:[#allocation2 + $0x188] sm:$0xf]  ;;  %v3916_v21 = vld [vmem:[#allocation2 + $0x194] sm:$0xf0] }
  0x8c   :  { %1817 = vmatpush.bf16.msrb.mxu2 %v3376_v28  ;;  %v2915_v22 = vld [vmem:[#allocation2 + $0x288] sm:$0xf]  ;;  %v3948_v23 = vld [vmem:[#allocation2 + $0x294] sm:$0xf0]  ;;  %v2660_v28 = vor.u32 %v3884_v18, %v2659_v17  ;;  %v2788_v29 = vor.u32 %v3916_v21, %v2787_v19 }
  0x8d   :  { %1830 = vmatpush.bf16.msrb.mxu3 %v3504_v34  ;;  %v3043_v24 = vld [vmem:[#allocation2 + $0x388] sm:$0xf]  ;;  %v3980_v27 = vld [vmem:[#allocation2 + $0x394] sm:$0xf0]  ;;  %v2916_v30 = vor.u32 %v3948_v23, %v2915_v22 }
  0x8e   :  { %1792 = vmatpush.bf16.msrb.mxu0 %v3104_v45  ;;  %v2643_v33 = vld [vmem:[#allocation2 + $0x68] sm:$0xf]  ;;  %v3880_v34 = vld [vmem:[#allocation2 + $0x74] sm:$0xf0]  ;;  %v3044_v37 = vor.u32 %v3980_v27, %v3043_v24 }
  0x8f   :  { %1805 = vmatpush.bf16.msrb.mxu1 %v3232_v49  ;;  %v2771_v35 = vld [vmem:[#allocation2 + $0x168] sm:$0xf]  ;;  %v3912_v38 = vld [vmem:[#allocation2 + $0x174] sm:$0xf0]  ;;  %v2644_v46 = vor.u32 %v3880_v34, %v2643_v33 }
  0x90   :  { %1818 = vmatpush.bf16.msrb.mxu2 %v3360_v50  ;;  %v2899_v41 = vld [vmem:[#allocation2 + $0x268] sm:$0xf]  ;;  %v3944_v43 = vld [vmem:[#allocation2 + $0x274] sm:$0xf0]  ;;  %v2772_v47 = vor.u32 %v3912_v38, %v2771_v35 }
  0x91   :  { %1831 = vmatpush.bf16.msrb.mxu3 %v3488_v53  ;;  %1793 = vmatmul.bf16.vlgmr.msrb.gmra.mxu0 %v4302_v39  ;;  %v3027_v44 = vld [vmem:[#allocation2 + $0x368] sm:$0xf]  ;;  %v3976_v45 = vld [vmem:[#allocation2 + $0x374] sm:$0xf0]  ;;  %v2900_v48 = vor.u32 %v3944_v43, %v2899_v41 }
  0x92   :  { %1837 = vmatpush.bf16.msra.mxu0 %v2708_v54  ;;  %1806 = vmatmul.bf16.vlgmr.msrb.gmra.mxu1 %v4306_v42  ;;  %v2627_v49 = vld [vmem:[#allocation2 + $0x48] sm:$0xf]  ;;  %v3876_v50 = vld [vmem:[#allocation2 + $0x54] sm:$0xf0]  ;;  %v3028_v52 = vor.u32 %v3976_v45, %v3027_v44 }
  0x93   :  { %1850 = vmatpush.bf16.msra.mxu1 %v2836_v55  ;;  %1819 = vmatmul.bf16.vlgmr.msrb.gmra.mxu2 %v4300_v36  ;;  %v2755_v51 = vld [vmem:[#allocation2 + $0x148] sm:$0xf]  ;;  %v3908_v53 = vld [vmem:[#allocation2 + $0x154] sm:$0xf0]  ;;  %v2628_v58 = vor.u32 %v3876_v50, %v2627_v49 }
  0x94   :  { %1863 = vmatpush.bf16.msra.mxu2 %v2964_v56  ;;  %1832 = vmatmul.bf16.vlgmr.msrb.gmra.mxu3 %v4304_v40  ;;  %v2883_v54 = vld [vmem:[#allocation2 + $0x248] sm:$0xf]  ;;  %v3940_v55 = vld [vmem:[#allocation2 + $0x254] sm:$0xf0]  ;;  %v2756_v59 = vor.u32 %v3908_v53, %v2755_v51 }
  0x95   :  { %1876 = vmatpush.bf16.msra.mxu3 %v3092_v60  ;;  %v3011_v56 = vld [vmem:[#allocation2 + $0x348] sm:$0xf]  ;;  %v3972_v57 = vld [vmem:[#allocation2 + $0x354] sm:$0xf0]  ;;  %v2884_v60 = vor.u32 %v3940_v55, %v2883_v54 }
  0x96   :  { %1838 = vmatpush.bf16.msra.mxu0 %v2692_v2  ;;  %v2611_v61 = vld [vmem:[#allocation2 + $0x28] sm:$0xf]  ;;  %v3872_v62 = vld [vmem:[#allocation2 + $0x34] sm:$0xf0]  ;;  %v3012_v0 = vor.u32 %v3972_v57, %v3011_v56 }
  0x97   :  { %1851 = vmatpush.bf16.msra.mxu1 %v2820_v3  ;;  %v2739_v63 = vld [vmem:[#allocation2 + $0x128] sm:$0xf]  ;;  %v3904_v1 = vld [vmem:[#allocation2 + $0x134] sm:$0xf0]  ;;  %v2612_v6 = vor.u32 %v3872_v62, %v2611_v61 }
  0x98   :  { %1864 = vmatpush.bf16.msra.mxu2 %v2948_v4  ;;  %v2867_v2 = vld [vmem:[#allocation2 + $0x228] sm:$0xf]  ;;  %v3936_v3 = vld [vmem:[#allocation2 + $0x234] sm:$0xf0]  ;;  %v2740_v9 = vor.u32 %v3904_v1, %v2739_v63 }
  0x99   :  { %1877 = vmatpush.bf16.msra.mxu3 %v3076_v8  ;;  %v2995_v4 = vld [vmem:[#allocation2 + $0x328] sm:$0xf]  ;;  %v3968_v5 = vld [vmem:[#allocation2 + $0x334] sm:$0xf0]  ;;  %v2868_v10 = vor.u32 %v3936_v3, %v2867_v2 }
  0x9a   :  { %1839 = vmatpush.bf16.msra.mxu0 %v2676_v14  ;;  %v2595_v7 = vld [vmem:[#allocation2 + $0x8] sm:$0xf]  ;;  %v3868_v8 = vld [vmem:[#allocation2 + $0x14] sm:$0xf0]  ;;  %v2996_v14 = vor.u32 %v3968_v5, %v2995_v4 }
  0x9b   :  { %1852 = vmatpush.bf16.msra.mxu1 %v2804_v15  ;;  %v2723_v11 = vld [vmem:[#allocation2 + $0x108] sm:$0xf]  ;;  %v3900_v12 = vld [vmem:[#allocation2 + $0x114] sm:$0xf0]  ;;  %v2596_v21 = vor.u32 %v3868_v8, %v2595_v7 }
  0x9c   :  { %1865 = vmatpush.bf16.msra.mxu2 %v2932_v16  ;;  %v2851_v13 = vld [vmem:[#allocation2 + $0x208] sm:$0xf]  ;;  %v3932_v15 = vld [vmem:[#allocation2 + $0x214] sm:$0xf0]  ;;  %v2724_v27 = vor.u32 %v3900_v12, %v2723_v11 }
  0x9d   :  { %1878 = vmatpush.bf16.msra.mxu3 %v3060_v20  ;;  %v2979_v16 = vld [vmem:[#allocation2 + $0x308] sm:$0xf]  ;;  %v3964_v17 = vld [vmem:[#allocation2 + $0x314] sm:$0xf0] }
  0x9e   :  { %1840 = vmatpush.bf16.msra.mxu0 %v2660_v28  ;;  %v3219_v18 = vld [vmem:[#allocation2 + $0x4e8] sm:$0xf]  ;;  %v4024_v19 = vld [vmem:[#allocation2 + $0x4f4] sm:$0xf0]  ;;  %v2852_v28 = vor.u32 %v3932_v15, %v2851_v13  ;;  %v2980_v33 = vor.u32 %v3964_v17, %v2979_v16 }
  0x9f   :  { %1853 = vmatpush.bf16.msra.mxu1 %v2788_v29  ;;  %v3347_v20 = vld [vmem:[#allocation2 + $0x5e8] sm:$0xf]  ;;  %v4056_v22 = vld [vmem:[#allocation2 + $0x5f4] sm:$0xf0]  ;;  %v3220_v34 = vor.u32 %v4024_v19, %v3219_v18 }
  0xa0   :  { %1866 = vmatpush.bf16.msra.mxu2 %v2916_v30  ;;  %v3475_v23 = vld [vmem:[#allocation2 + $0x6e8] sm:$0xf]  ;;  %v4088_v24 = vld [vmem:[#allocation2 + $0x6f4] sm:$0xf0]  ;;  %v3348_v35 = vor.u32 %v4056_v22, %v3347_v20 }
  0xa1   :  { %1879 = vmatpush.bf16.msra.mxu3 %v3044_v37  ;;  %v3603_v29 = vld [vmem:[#allocation2 + $0x7e8] sm:$0xf]  ;;  %v4120_v30 = vld [vmem:[#allocation2 + $0x7f4] sm:$0xf0]  ;;  %v3476_v37 = vor.u32 %v4088_v24, %v3475_v23 }
  0xa2   :  { %1841 = vmatpush.bf16.msra.mxu0 %v2644_v46  ;;  %v3203_v38 = vld [vmem:[#allocation2 + $0x4c8] sm:$0xf]  ;;  %v4020_v41 = vld [vmem:[#allocation2 + $0x4d4] sm:$0xf0]  ;;  %v3604_v44 = vor.u32 %v4120_v30, %v3603_v29 }
  0xa3   :  { %1854 = vmatpush.bf16.msra.mxu1 %v2772_v47  ;;  %v3331_v43 = vld [vmem:[#allocation2 + $0x5c8] sm:$0xf]  ;;  %v4052_v45 = vld [vmem:[#allocation2 + $0x5d4] sm:$0xf0]  ;;  %v3204_v50 = vor.u32 %v4020_v41, %v3203_v38 }
  0xa4   :  { %1867 = vmatpush.bf16.msra.mxu2 %v2900_v48  ;;  %v3459_v46 = vld [vmem:[#allocation2 + $0x6c8] sm:$0xf]  ;;  %v4084_v47 = vld [vmem:[#allocation2 + $0x6d4] sm:$0xf0]  ;;  %v3332_v51 = vor.u32 %v4052_v45, %v3331_v43 }
  0xa5   :  { %1880 = vmatpush.bf16.msra.mxu3 %v3028_v52  ;;  %v3587_v48 = vld [vmem:[#allocation2 + $0x7c8] sm:$0xf]  ;;  %v4116_v49 = vld [vmem:[#allocation2 + $0x7d4] sm:$0xf0]  ;;  %v3460_v52 = vor.u32 %v4084_v47, %v3459_v46 }
  0xa6   :  { %1842 = vmatpush.bf16.msra.mxu0 %v2628_v58  ;;  %v3187_v53 = vld [vmem:[#allocation2 + $0x4a8] sm:$0xf]  ;;  %v4016_v54 = vld [vmem:[#allocation2 + $0x4b4] sm:$0xf0]  ;;  %v3588_v56 = vor.u32 %v4116_v49, %v3587_v48 }
  0xa7   :  { %1855 = vmatpush.bf16.msra.mxu1 %v2756_v59  ;;  %v3315_v55 = vld [vmem:[#allocation2 + $0x5a8] sm:$0xf]  ;;  %v4048_v57 = vld [vmem:[#allocation2 + $0x5b4] sm:$0xf0]  ;;  %v3188_v62 = vor.u32 %v4016_v54, %v3187_v53 }
  0xa8   :  { %1868 = vmatpush.bf16.msra.mxu2 %v2884_v60  ;;  %v3443_v58 = vld [vmem:[#allocation2 + $0x6a8] sm:$0xf]  ;;  %v4080_v59 = vld [vmem:[#allocation2 + $0x6b4] sm:$0xf0]  ;;  %v3316_v63 = vor.u32 %v4048_v57, %v3315_v55 }
  0xa9   :  { %1881 = vmatpush.bf16.msra.mxu3 %v3012_v0  ;;  %v3571_v60 = vld [vmem:[#allocation2 + $0x7a8] sm:$0xf]  ;;  %v4112_v61 = vld [vmem:[#allocation2 + $0x7b4] sm:$0xf0]  ;;  %v3444_v0 = vor.u32 %v4080_v59, %v3443_v58 }
  0xaa   :  { %1843 = vmatpush.bf16.msra.mxu0 %v2612_v6  ;;  %v3171_v1 = vld [vmem:[#allocation2 + $0x488] sm:$0xf]  ;;  %v4012_v2 = vld [vmem:[#allocation2 + $0x494] sm:$0xf0]  ;;  %v3572_v4 = vor.u32 %v4112_v61, %v3571_v60 }
  0xab   :  { %1856 = vmatpush.bf16.msra.mxu1 %v2740_v9  ;;  %v3299_v3 = vld [vmem:[#allocation2 + $0x588] sm:$0xf]  ;;  %v4044_v5 = vld [vmem:[#allocation2 + $0x594] sm:$0xf0] }
  0xac   :  { %1869 = vmatpush.bf16.msra.mxu2 %v2868_v10  ;;  %v3427_v6 = vld [vmem:[#allocation2 + $0x688] sm:$0xf]  ;;  %v4076_v7 = vld [vmem:[#allocation2 + $0x694] sm:$0xf0]  ;;  %v3172_v10 = vor.u32 %v4012_v2, %v3171_v1  ;;  %v3300_v11 = vor.u32 %v4044_v5, %v3299_v3 }
  0xad   :  { %1882 = vmatpush.bf16.msra.mxu3 %v2996_v14  ;;  %v3555_v8 = vld [vmem:[#allocation2 + $0x788] sm:$0xf]  ;;  %v4108_v9 = vld [vmem:[#allocation2 + $0x794] sm:$0xf0]  ;;  %v3428_v12 = vor.u32 %v4076_v7, %v3427_v6 }
  0xae   :  { %1844 = vmatpush.bf16.msra.mxu0 %v2596_v21  ;;  %v3155_v13 = vld [vmem:[#allocation2 + $0x468] sm:$0xf]  ;;  %v4008_v14 = vld [vmem:[#allocation2 + $0x474] sm:$0xf0]  ;;  %v3556_v16 = vor.u32 %v4108_v9, %v3555_v8  ;;  %v3894_v8 = vld [vmem:[#allocation2 + $0xec] sm:$0xf] }
  0xaf   :  { %1857 = vmatpush.bf16.msra.mxu1 %v2724_v27  ;;  %v3283_v15 = vld [vmem:[#allocation2 + $0x568] sm:$0xf]  ;;  %v4040_v17 = vld [vmem:[#allocation2 + $0x574] sm:$0xf0]  ;;  %v3156_v22 = vor.u32 %v4008_v14, %v3155_v13  ;;  %v2709_v9 = vld [vmem:[#allocation2 + $0xf8] sm:$0xf0] }
  0xb0   :  { %1870 = vmatpush.bf16.msra.mxu2 %v2852_v28  ;;  %v3411_v18 = vld [vmem:[#allocation2 + $0x668] sm:$0xf]  ;;  %v4072_v19 = vld [vmem:[#allocation2 + $0x674] sm:$0xf0]  ;;  %v3284_v24 = vor.u32 %v4040_v17, %v3283_v15  ;;  %v2837_v13 = vld [vmem:[#allocation2 + $0x1f8] sm:$0xf0] }
  0xb1   :  { %1883 = vmatpush.bf16.msra.mxu3 %v2980_v33  ;;  %1845 = vmatmul.bf16.vlgmr.msra.gmra.mxu0 %v4287_v26  ;;  %v3539_v20 = vld [vmem:[#allocation2 + $0x768] sm:$0xf]  ;;  %v4104_v21 = vld [vmem:[#allocation2 + $0x774] sm:$0xf0]  ;;  %v3412_v27 = vor.u32 %v4072_v19, %v3411_v18  ;;  %v3958_v14 = vld [vmem:[#allocation2 + $0x2ec] sm:$0xf] }
  0xb2   :  { %1889 = vmatpush.bf16.msrb.mxu0 %v3220_v34  ;;  %1858 = vmatmul.bf16.vlgmr.msra.gmra.mxu1 %v4291_v32  ;;  %v3139_v23 = vld [vmem:[#allocation2 + $0x448] sm:$0xf]  ;;  %v4004_v28 = vld [vmem:[#allocation2 + $0x454] sm:$0xf0]  ;;  %v3540_v33 = vor.u32 %v4104_v21, %v3539_v20  ;;  %v2965_v15 = vld [vmem:[#allocation2 + $0x2f8] sm:$0xf0] }
  0xb3   :  { %1902 = vmatpush.bf16.msrb.mxu1 %v3348_v35  ;;  %1871 = vmatmul.bf16.vlgmr.msra.gmra.mxu2 %v4285_v25  ;;  %v3267_v29 = vld [vmem:[#allocation2 + $0x548] sm:$0xf]  ;;  %v4327_v30 = vld [vmem:[%s4393_s3] sm:$0xf]  ;;  %v3140_v43 = vor.u32 %v4004_v28, %v3139_v23  ;;  %v3990_v19 = vld [vmem:[#allocation2 + $0x3ec] sm:$0xf] }
  0xb4   :  { %1915 = vmatpush.bf16.msrb.mxu2 %v3476_v37  ;;  %1884 = vmatmul.bf16.vlgmr.msra.gmra.mxu3 %v4289_v31  ;;  %v4036_v34 = vld [vmem:[#allocation2 + $0x554] sm:$0xf0]  ;;  %v3395_v35 = vld [vmem:[#allocation2 + $0x648] sm:$0xf]  ;;  %v3093_v20 = vld [vmem:[#allocation2 + $0x3f8] sm:$0xf0] }
  0xb5   :  { %1928 = vmatpush.bf16.msrb.mxu3 %v3604_v44  ;;  %v4068_v37 = vld [vmem:[#allocation2 + $0x654] sm:$0xf0]  ;;  %v3523_v38 = vld [vmem:[#allocation2 + $0x748] sm:$0xf]  ;;  %v341_v44 = vperm.slane %v4327_v30, 0  ;;  %v3268_v45 = vor.u32 %v4036_v34, %v3267_v29 }
  0xb6   :  { %1890 = vmatpush.bf16.msrb.mxu0 %v3204_v50  ;;  %v4100_v41 = vld [vmem:[#allocation2 + $0x754] sm:$0xf0]  ;;  %v3396_v46 = vor.u32 %v4068_v37, %v3395_v35  ;;  %v3123_v47 = vld [vmem:[#allocation2 + $0x428] sm:$0xf]  ;;  %v3890_v28 = vld [vmem:[#allocation2 + $0xcc] sm:$0xf]  ;;  %v3096_v37 = vor.u32 %v3990_v19, %v3093_v20 }
  0xb7   :  { %1903 = vmatpush.bf16.msrb.mxu1 %v3332_v51  ;;  %v4000_v48 = vld [vmem:[#allocation2 + $0x434] sm:$0xf0]  ;;  %v3251_v49 = vld [vmem:[#allocation2 + $0x528] sm:$0xf]  ;;  %v3524_v50 = vor.u32 %v4100_v41, %v3523_v38  ;;  %v2693_v29 = vld [vmem:[#allocation2 + $0xd8] sm:$0xf0] }
  0xb8   :  { %1916 = vmatpush.bf16.msrb.mxu2 %v3460_v52  ;;  %v4032_v51 = vld [vmem:[#allocation2 + $0x534] sm:$0xf0]  ;;  %v3379_v52 = vld [vmem:[#allocation2 + $0x628] sm:$0xf]  ;;  %v3124_v57 = vor.u32 %v4000_v48, %v3123_v47  ;;  %v2821_v38 = vld [vmem:[#allocation2 + $0x1d8] sm:$0xf0]  ;;  %v2696_v47 = vor.u32 %v3890_v28, %v2693_v29 }
  0xb9   :  { %1929 = vmatpush.bf16.msrb.mxu3 %v3588_v56  ;;  %v4064_v53 = vld [vmem:[#allocation2 + $0x634] sm:$0xf0]  ;;  %v3507_v54 = vld [vmem:[#allocation2 + $0x728] sm:$0xf]  ;;  %v3954_v41 = vld [vmem:[#allocation2 + $0x2cc] sm:$0xf] }
  0xba   :  { %1891 = vmatpush.bf16.msrb.mxu0 %v3188_v62  ;;  %v4096_v55 = vld [vmem:[#allocation2 + $0x734] sm:$0xf0]  ;;  %v3107_v58 = vld [vmem:[#allocation2 + $0x408] sm:$0xf]  ;;  %v3252_v62 = vor.u32 %v4032_v51, %v3251_v49  ;;  %v2677_v51 = vld [vmem:[#allocation2 + $0xb8] sm:$0xf0] }
  0xbb   :  { %1904 = vmatpush.bf16.msrb.mxu1 %v3316_v63  ;;  %v3996_v59 = vld [vmem:[#allocation2 + $0x414] sm:$0xf0]  ;;  %v3380_v63 = vor.u32 %v4064_v53, %v3379_v52  ;;  %v3363_v2 = vld [vmem:[#allocation2 + $0x608] sm:$0xf]  ;;  %v3508_v3 = vor.u32 %v4096_v55, %v3507_v54  ;;  %v3918_v52 = vld [vmem:[#allocation2 + $0x1ac] sm:$0xf] }
  0xbc   :  { %1917 = vmatpush.bf16.msrb.mxu2 %v3444_v0  ;;  %v3235_v0 = vld [vmem:[#allocation2 + $0x508] sm:$0xf]  ;;  %v4028_v1 = vld [vmem:[#allocation2 + $0x514] sm:$0xf0]  ;;  %v2805_v55 = vld [vmem:[#allocation2 + $0x1b8] sm:$0xf0] }
  0xbd   :  { %1930 = vmatpush.bf16.msrb.mxu3 %v3572_v4  ;;  %v4060_v4 = vld [vmem:[#allocation2 + $0x614] sm:$0xf0]  ;;  %v3491_v5 = vld [vmem:[#allocation2 + $0x708] sm:$0xf]  ;;  %v3236_v17 = vor.u32 %v4028_v1, %v3235_v0  ;;  %v3882_v0 = vld [vmem:[#allocation2 + $0x8c] sm:$0xf] }
  0xbe   :  { %1892 = vmatpush.bf16.msrb.mxu0 %v3172_v10  ;;  %v4092_v6 = vld [vmem:[#allocation2 + $0x714] sm:$0xf0]  ;;  %v3926_v10 = vld [vmem:[#allocation2 + $0x1ec] sm:$0xf]  ;;  %v3364_v18 = vor.u32 %v4060_v4, %v3363_v2  ;;  %v2661_v1 = vld [vmem:[#allocation2 + $0x98] sm:$0xf0] }
  0xbf   :  { %1905 = vmatpush.bf16.msrb.mxu1 %v3300_v11  ;;  %v1638_v56 = vpop.f32.mrf.mxu0  ;;  %v3492_v21 = vor.u32 %v4092_v6, %v3491_v5  ;;  %v3914_v2 = vld [vmem:[#allocation2 + $0x18c] sm:$0xf]  ;;  %v2789_v4 = vld [vmem:[#allocation2 + $0x198] sm:$0xf0] }
  0xc0   :  { %1918 = vmatpush.bf16.msrb.mxu2 %v3428_v12  ;;  %v1639_v60 = vadd.f32 %v1638_v56, %v341_v44  ;;  %v1651_v61 = vpop.f32.mrf.mxu1  ;;  %v3108_v12 = vor.u32 %v3996_v59, %v3107_v58  ;;  %v3950_v56 = vld [vmem:[#allocation2 + $0x2ac] sm:$0xf]  ;;  %v3061_v59 = vld [vmem:[#allocation2 + $0x3b8] sm:$0xf0] }
  0xc1   :  { %1931 = vmatpush.bf16.msrb.mxu3 %v3556_v16  ;;  %v3982_v58 = vld [vmem:[#allocation2 + $0x3ac] sm:$0xf]  ;;  %v2917_v6 = vld [vmem:[#allocation2 + $0x298] sm:$0xf0] }
  0xc2   :  { %1893 = vmatpush.bf16.msrb.mxu0 %v3156_v22  ;;  %v1652_v7 = vadd.f32 %v1651_v61, %v1639_v60  ;;  %v2712_v22 = vor.u32 %v3894_v8, %v2709_v9  ;;  %v3946_v5 = vld [vmem:[#allocation2 + $0x28c] sm:$0xf]  ;;  %v3045_v8 = vld [vmem:[#allocation2 + $0x398] sm:$0xf0]  ;;  %v2664_v9 = vor.u32 %v3882_v0, %v2661_v1 }
  0xc3   :  { %1906 = vmatpush.bf16.msrb.mxu1 %v3284_v24  ;;  %v2840_v24 = vor.u32 %v3926_v10, %v2837_v13  ;;  %v3878_v13 = vld [vmem:[#allocation2 + $0x6c] sm:$0xf]  ;;  %v2773_v19 = vld [vmem:[#allocation2 + $0x178] sm:$0xf0] }
  0xc4   :  { %1919 = vmatpush.bf16.msrb.mxu2 %v3412_v27  ;;  %v2968_v27 = vor.u32 %v3958_v14, %v2965_v15  ;;  %v2645_v14 = vld [vmem:[#allocation2 + $0x78] sm:$0xf0]  ;;  %v3910_v15 = vld [vmem:[#allocation2 + $0x16c] sm:$0xf] }
  0xc5   :  { %1932 = vmatpush.bf16.msrb.mxu3 %v3540_v33  ;;  %v1664_v11 = vpop.f32.mrf.mxu2  ;;  %v3922_v33 = vld [vmem:[#allocation2 + $0x1cc] sm:$0xf]  ;;  %v2776_v28 = vor.u32 %v3910_v15, %v2773_v19  ;;  %v3221_v15 = vld [vmem:[#allocation2 + $0x4f8] sm:$0xf0] }
  0xc6   :  { %1894 = vmatpush.bf16.msrb.mxu0 %v3140_v43  ;;  %v1665_v16 = vadd.f32 %v1664_v11, %v1652_v7  ;;  %v1677_v23 = vpop.f32.mrf.mxu3  ;;  %v2949_v43 = vld [vmem:[#allocation2 + $0x2d8] sm:$0xf0]  ;;  %v2824_v48 = vor.u32 %v3922_v33, %v2821_v38  ;;  %v3978_v7 = vld [vmem:[#allocation2 + $0x38c] sm:$0xf]  ;;  %v2792_v11 = vor.u32 %v3914_v2, %v2789_v4 }
  0xc7   :  { %1907 = vmatpush.bf16.msrb.mxu1 %v3268_v45  ;;  %v1640_v35 = vpop.f32.mrf.mxu0  ;;  %v3986_v45 = vld [vmem:[#allocation2 + $0x3cc] sm:$0xf]  ;;  %v2952_v49 = vor.u32 %v3954_v41, %v2949_v43  ;;  %v2757_v41 = vld [vmem:[#allocation2 + $0x158] sm:$0xf0] }
  0xc8   :  { %1920 = vmatpush.bf16.msrb.mxu2 %v3396_v46  ;;  %v1678_v34 = vadd.f32 %v1677_v23, %v1665_v16  ;;  %v1653_v44 = vpop.f32.mrf.mxu1  ;;  %v3077_v46 = vld [vmem:[#allocation2 + $0x3d8] sm:$0xf0]  ;;  %v3942_v20 = vld [vmem:[#allocation2 + $0x26c] sm:$0xf] }
  0xc9   :  { %1933 = vmatpush.bf16.msrb.mxu3 %v3524_v50  ;;  %v3886_v50 = vld [vmem:[#allocation2 + $0xac] sm:$0xf]  ;;  %v3080_v54 = vor.u32 %v3986_v45, %v3077_v46  ;;  %v3029_v23 = vld [vmem:[#allocation2 + $0x378] sm:$0xf0] }
  0xca   :  { %1895 = vmatpush.bf16.msrb.mxu0 %v3124_v57  ;;  %v2933_v57 = vld [vmem:[#allocation2 + $0x2b8] sm:$0xf0]  ;;  %v2680_v60 = vor.u32 %v3886_v50, %v2677_v51  ;;  %v3874_v33 = vld [vmem:[#allocation2 + $0x4c] sm:$0xf] }
  0xcb   :  { %1908 = vmatpush.bf16.msrb.mxu1 %v3252_v62  ;;  %v2808_v62 = vor.u32 %v3918_v52, %v2805_v55  ;;  %v2629_v35 = vld [vmem:[#allocation2 + $0x58] sm:$0xf0]  ;;  %v3938_v43 = vld [vmem:[#allocation2 + $0x24c] sm:$0xf] }
  0xcc   :  { %1921 = vmatpush.bf16.msrb.mxu2 %v3380_v63  ;;  %v2936_v63 = vor.u32 %v3950_v56, %v2933_v57  ;;  %v2885_v44 = vld [vmem:[#allocation2 + $0x258] sm:$0xf0]  ;;  %v3902_v56 = vld [vmem:[#allocation2 + $0x12c] sm:$0xf] }
  0xcd   :  { %1934 = vmatpush.bf16.msrb.mxu3 %v3508_v3  ;;  %v1666_v53 = vpop.f32.mrf.mxu2  ;;  %v3064_v3 = vor.u32 %v3982_v58, %v3061_v59  ;;  %v2613_v55 = vld [vmem:[#allocation2 + $0x38] sm:$0xf0]  ;;  %v3866_v1 = vld [vmem:[#allocation2 + $0xc] sm:$0xf] }
  0xce   :  { %1896 = vmatpush.bf16.msrb.mxu0 %v3108_v12  ;;  %v1679_v61 = vpop.f32.mrf.mxu3  ;;  %v2920_v12 = vor.u32 %v3946_v5, %v2917_v6  ;;  %v2888_v53 = vor.u32 %v3938_v43, %v2885_v44  ;;  %v2741_v59 = vld [vmem:[#allocation2 + $0x138] sm:$0xf0]  ;;  %v3898_v5 = vld [vmem:[#allocation2 + $0x10c] sm:$0xf] }
  0xcf   :  { %1909 = vmatpush.bf16.msrb.mxu1 %v3236_v17  ;;  %v2869_v61 = vld [vmem:[#allocation2 + $0x238] sm:$0xf0]  ;;  %v4086_v19 = vld [vmem:[#allocation2 + $0x6ec] sm:$0xf] }
  0xd0   :  { %1922 = vmatpush.bf16.msrb.mxu2 %v3364_v18  ;;  %v3048_v18 = vor.u32 %v3978_v7, %v3045_v8  ;;  %v2597_v2 = vld [vmem:[#allocation2 + $0x18] sm:$0xf0]  ;;  %v3930_v7 = vld [vmem:[#allocation2 + $0x20c] sm:$0xf] }
  0xd1   :  { %1935 = vmatpush.bf16.msrb.mxu3 %v3492_v21  ;;  %1897 = vmatmul.bf16.vlgmr.msrb.gmra.mxu0 %v4302_v39  ;;  %v1690_v10 = vpop.f32.mrf.mxu0  ;;  %v2901_v21 = vld [vmem:[#allocation2 + $0x278] sm:$0xf0]  ;;  %v4082_v43 = vld [vmem:[#allocation2 + $0x6cc] sm:$0xf] }
  0xd2   :  { %1941 = vmatpush.bf16.msra.mxu0 %v2712_v22  ;;  %1910 = vmatmul.bf16.vlgmr.msrb.gmra.mxu1 %v4306_v42  ;;  %v1691_v16 = vadd.f32 %v1690_v10, %v1678_v34  ;;  %v1703_v17 = vpop.f32.mrf.mxu1  ;;  %v3974_v22 = vld [vmem:[#allocation2 + $0x36c] sm:$0xf]  ;;  %v2904_v29 = vor.u32 %v3942_v20, %v2901_v21  ;;  %v2725_v6 = vld [vmem:[#allocation2 + $0x118] sm:$0xf0] }
  0xd3   :  { %1954 = vmatpush.bf16.msra.mxu1 %v2840_v24  ;;  %1923 = vmatmul.bf16.vlgmr.msrb.gmra.mxu2 %v4300_v36  ;;  %v3032_v34 = vor.u32 %v3974_v22, %v3029_v23  ;;  %v2853_v10 = vld [vmem:[#allocation2 + $0x218] sm:$0xf0]  ;;  %v2728_v21 = vor.u32 %v3898_v5, %v2725_v6  ;;  %v4118_v23 = vld [vmem:[#allocation2 + $0x7ec] sm:$0xf] }
  0xd4   :  { %1967 = vmatpush.bf16.msra.mxu2 %v2968_v27  ;;  %1936 = vmatmul.bf16.vlgmr.msrb.gmra.mxu3 %v4304_v40  ;;  %v1704_v24 = vadd.f32 %v1703_v17, %v1691_v16  ;;  %v2648_v27 = vor.u32 %v3878_v13, %v2645_v14  ;;  %v4022_v14 = vld [vmem:[#allocation2 + $0x4ec] sm:$0xf]  ;;  %v2600_v17 = vor.u32 %v3866_v1, %v2597_v2  ;;  %v3477_v20 = vld [vmem:[#allocation2 + $0x6f8] sm:$0xf0] }
  0xd5   :  { %1980 = vmatpush.bf16.msra.mxu3 %v3096_v37  ;;  %v3906_v37 = vld [vmem:[#allocation2 + $0x14c] sm:$0xf]  ;;  %v2856_v22 = vor.u32 %v3930_v7, %v2853_v10  ;;  %v3461_v44 = vld [vmem:[#allocation2 + $0x6d8] sm:$0xf0] }
  0xd6   :  { %1942 = vmatpush.bf16.msra.mxu0 %v2696_v47  ;;  %v1716_v38 = vpop.f32.mrf.mxu2  ;;  %v3970_v47 = vld [vmem:[#allocation2 + $0x34c] sm:$0xf]  ;;  %v2760_v52 = vor.u32 %v3906_v37, %v2757_v41  ;;  %v3205_v37 = vld [vmem:[#allocation2 + $0x4d8] sm:$0xf0] }
  0xd7   :  { %1955 = vmatpush.bf16.msra.mxu1 %v2824_v48  ;;  %v1717_v45 = vadd.f32 %v1716_v38, %v1704_v24  ;;  %v3013_v48 = vld [vmem:[#allocation2 + $0x358] sm:$0xf0]  ;;  %v4054_v16 = vld [vmem:[#allocation2 + $0x5ec] sm:$0xf] }
  0xd8   :  { %1968 = vmatpush.bf16.msra.mxu2 %v2952_v49  ;;  %v2632_v49 = vor.u32 %v3874_v33, %v2629_v35  ;;  %v3016_v58 = vor.u32 %v3970_v47, %v3013_v48  ;;  %v3605_v24 = vld [vmem:[#allocation2 + $0x7f8] sm:$0xf0]  ;;  %v3480_v33 = vor.u32 %v4086_v19, %v3477_v20  ;;  %v4018_v35 = vld [vmem:[#allocation2 + $0x4cc] sm:$0xf] }
  0xd9   :  { %1981 = vmatpush.bf16.msra.mxu3 %v3080_v54  ;;  %v1729_v46 = vpop.f32.mrf.mxu3  ;;  %v1692_v51 = vpop.f32.mrf.mxu0  ;;  %v3870_v54 = vld [vmem:[#allocation2 + $0x2c] sm:$0xf]  ;;  %v3333_v41 = vld [vmem:[#allocation2 + $0x5d8] sm:$0xf0]  ;;  %v3208_v47 = vor.u32 %v4018_v35, %v3205_v37 }
  0xda   :  { %1943 = vmatpush.bf16.msra.mxu0 %v2680_v60  ;;  %v4334_v50 = vadd.f32 %v1729_v46, %v1717_v45  ;;  %v1705_v57 = vpop.f32.mrf.mxu1  ;;  %v3934_v60 = vld [vmem:[#allocation2 + $0x22c] sm:$0xf]  ;;  %v2616_v0 = vor.u32 %v3870_v54, %v2613_v55  ;;  %v3589_v46 = vld [vmem:[#allocation2 + $0x7d8] sm:$0xf0] }
  0xdb   :  { %1956 = vmatpush.bf16.msra.mxu1 %v2808_v62  ;;  %v3966_v62 = vld [vmem:[#allocation2 + $0x32c] sm:$0xf]  ;;  %v2872_v4 = vor.u32 %v3934_v60, %v2869_v61  ;;  %v3317_v55 = vld [vmem:[#allocation2 + $0x5b8] sm:$0xf0] }
  0xdc   :  { %1969 = vmatpush.bf16.msra.mxu2 %v2936_v63  ;;  %v2997_v63 = vld [vmem:[#allocation2 + $0x338] sm:$0xf0]  ;;  %v4050_v38 = vld [vmem:[#allocation2 + $0x5cc] sm:$0xf]  ;;  %vm2045_vm1 = vcmp.gt.f32.partialorder %v4334_v50, 0.0 }
  0xdd   :  { %1982 = vmatpush.bf16.msra.mxu3 %v3064_v3  ;;  %v2744_v3 = vor.u32 %v3902_v56, %v2741_v59  ;;  %v4114_v45 = vld [vmem:[#allocation2 + $0x7cc] sm:$0xf]  ;;  %v3336_v48 = vor.u32 %v4050_v38, %v3333_v41  ;;  %v3445_v57 = vld [vmem:[#allocation2 + $0x6b8] sm:$0xf0] }
  0xde   :  { %1944 = vmatpush.bf16.msra.mxu0 %v2664_v9  ;;  %v1718_v8 = vpop.f32.mrf.mxu2  ;;  %v3000_v9 = vor.u32 %v3966_v62, %v2997_v63  ;;  %v4014_v51 = vld [vmem:[#allocation2 + $0x4ac] sm:$0xf]  ;;  %v3592_v54 = vor.u32 %v4114_v45, %v3589_v46  ;;  %v3573_v59 = vld [vmem:[#allocation2 + $0x7b8] sm:$0xf0] }
  0xdf   :  { %1957 = vmatpush.bf16.msra.mxu1 %v2792_v11  ;;  %v3962_v11 = vld [vmem:[#allocation2 + $0x30c] sm:$0xf]  ;;  %v3301_v2 = vld [vmem:[#allocation2 + $0x598] sm:$0xf0] }
  0xe0   :  { %1970 = vmatpush.bf16.msra.mxu2 %v2920_v12  ;;  %v2981_v12 = vld [vmem:[#allocation2 + $0x318] sm:$0xf0]  ;;  %v4078_v56 = vld [vmem:[#allocation2 + $0x6ac] sm:$0xf] }
  0xe1   :  { %1983 = vmatpush.bf16.msra.mxu3 %v3048_v18  ;;  %v1731_v13 = vpop.f32.mrf.mxu3  ;;  %v3349_v18 = vld [vmem:[#allocation2 + $0x5f8] sm:$0xf0]  ;;  %v3448_v62 = vor.u32 %v4078_v56, %v3445_v57  ;;  %v4010_v63 = vld [vmem:[#allocation2 + $0x48c] sm:$0xf]  ;;  %v342_v56 = vperm.slane %v4327_v30, 1 }
  0xe2   :  { %1945 = vmatpush.bf16.msra.mxu0 %v2648_v27  ;;  %v2984_v27 = vor.u32 %v3962_v11, %v2981_v12  ;;  %v4106_v5 = vld [vmem:[#allocation2 + $0x78c] sm:$0xf]  ;;  %v3285_v13 = vld [vmem:[#allocation2 + $0x578] sm:$0xf0]  ;;  %v4136_v30 = vld [vmem:[#allocation4 + $0x74] sm:$0xf0] }
  0xe3   :  { %1958 = vmatpush.bf16.msra.mxu1 %v2776_v28  ;;  %v3224_v28 = vor.u32 %v4022_v14, %v3221_v15  ;;  %v4006_v8 = vld [vmem:[#allocation2 + $0x46c] sm:$0xf]  ;;  %v3413_v15 = vld [vmem:[#allocation2 + $0x678] sm:$0xf0] }
  0xe4   :  { %1971 = vmatpush.bf16.msra.mxu2 %v2904_v29  ;;  %v3352_v29 = vor.u32 %v4054_v16, %v3349_v18  ;;  %v4038_v10 = vld [vmem:[#allocation2 + $0x56c] sm:$0xf]  ;;  %v3525_v38 = vld [vmem:[#allocation2 + $0x758] sm:$0xf0] }
  0xe5   :  { %1984 = vmatpush.bf16.msra.mxu3 %v3032_v34  ;;  %v3608_v34 = vor.u32 %v4118_v23, %v3605_v24  ;;  %v4070_v14 = vld [vmem:[#allocation2 + $0x66c] sm:$0xf]  ;;  %v3288_v19 = vor.u32 %v4038_v10, %v3285_v13  ;;  %v3125_v46 = vld [vmem:[#allocation2 + $0x438] sm:$0xf0] }
  0xe6   :  { %1946 = vmatpush.bf16.msra.mxu0 %v2632_v49  ;;  %v3464_v49 = vor.u32 %v4082_v43, %v3461_v44  ;;  %v4102_v16 = vld [vmem:[#allocation2 + $0x76c] sm:$0xf]  ;;  %v3416_v20 = vor.u32 %v4070_v14, %v3413_v15 }
  0xe7   :  { %1959 = vmatpush.bf16.msra.mxu1 %v2760_v52  ;;  %v3189_v52 = vld [vmem:[#allocation2 + $0x4b8] sm:$0xf0]  ;;  %v4034_v23 = vld [vmem:[#allocation2 + $0x54c] sm:$0xf] }
  0xe8   :  { %1972 = vmatpush.bf16.msra.mxu2 %v2888_v53  ;;  %v4046_v53 = vld [vmem:[#allocation2 + $0x5ac] sm:$0xf]  ;;  %v3192_v60 = vor.u32 %v4014_v51, %v3189_v52  ;;  %v3253_v51 = vld [vmem:[#allocation2 + $0x538] sm:$0xf0] }
  0xe9   :  { %1985 = vmatpush.bf16.msra.mxu3 %v3016_v58  ;;  %v4110_v58 = vld [vmem:[#allocation2 + $0x7ac] sm:$0xf]  ;;  %v3320_v61 = vor.u32 %v4046_v53, %v3317_v55  ;;  %v3381_v53 = vld [vmem:[#allocation2 + $0x638] sm:$0xf0] }
  0xea   :  { %1947 = vmatpush.bf16.msra.mxu0 %v2616_v0  ;;  %v3173_v0 = vld [vmem:[#allocation2 + $0x498] sm:$0xf0]  ;;  %v3576_v1 = vor.u32 %v4110_v58, %v3573_v59  ;;  %v4098_v37 = vld [vmem:[#allocation2 + $0x74c] sm:$0xf] }
  0xeb   :  { %1960 = vmatpush.bf16.msra.mxu1 %v2744_v3  ;;  %v4074_v3 = vld [vmem:[#allocation2 + $0x68c] sm:$0xf]  ;;  %v3509_v55 = vld [vmem:[#allocation2 + $0x738] sm:$0xf0] }
  0xec   :  { %1973 = vmatpush.bf16.msra.mxu2 %v2872_v4  ;;  %v3429_v4 = vld [vmem:[#allocation2 + $0x698] sm:$0xf0]  ;;  %v3998_v45 = vld [vmem:[#allocation2 + $0x42c] sm:$0xf] }
  0xed   :  { %1986 = vmatpush.bf16.msra.mxu3 %v3000_v9  ;;  %v3432_v7 = vor.u32 %v4074_v3, %v3429_v4  ;;  %v3157_v9 = vld [vmem:[#allocation2 + $0x478] sm:$0xf0]  ;;  %v4062_v52 = vld [vmem:[#allocation2 + $0x62c] sm:$0xf]  ;;  %v3128_v57 = vor.u32 %v3998_v45, %v3125_v46  ;;  %v3635_v45 = vld [vmem:[#allocation4 + $0x30] sm:$0xf] }
  0xee   :  { %1948 = vmatpush.bf16.msra.mxu0 %v2600_v17  ;;  %v4340_v6 = vpop.f32.mrf.mxu0  ;;  %v3541_v17 = vld [vmem:[#allocation2 + $0x778] sm:$0xf0]  ;;  %v3160_v18 = vor.u32 %v4006_v8, %v3157_v9  ;;  %v3994_v58 = vld [vmem:[#allocation2 + $0x40c] sm:$0xf]  ;;  %v4152_v8 = vld [vmem:[#allocation4 + $0xf4] sm:$0xf0] }
  0xef   :  { %1961 = vmatpush.bf16.msra.mxu1 %v2728_v21  ;;  %v4342_v11 = vpop.f32.mrf.mxu1  ;;  %v4002_v21 = vld [vmem:[#allocation2 + $0x44c] sm:$0xf]  ;;  %v3699_v46 = vld [vmem:[#allocation4 + $0xb0] sm:$0xf] }
  0xf0   :  { %1974 = vmatpush.bf16.msra.mxu2 %v2856_v22  ;;  %v3141_v22 = vld [vmem:[#allocation2 + $0x458] sm:$0xf0]  ;;  %v4090_v3 = vld [vmem:[#allocation2 + $0x70c] sm:$0xf] }
  0xf1   :  { %1987 = vmatpush.bf16.msra.mxu3 %v2984_v27  ;;  %1949 = vmatmul.bf16.vlgmr.msra.gmra.mxu0 %v4287_v26  ;;  %v3557_v26 = vld [vmem:[#allocation2 + $0x798] sm:$0xf0]  ;;  %v3544_v27 = vor.u32 %v4102_v16, %v3541_v17  ;;  %v3659_v16 = vld [vmem:[#allocation4 + $0x60] sm:$0xf]  ;;  %v4134_v17 = vld [vmem:[#allocation4 + $0x64] sm:$0xf0] }
  0xf2   :  { %1993 = vmatpush.bf16.msrb.mxu0 %v3224_v28  ;;  %1962 = vmatmul.bf16.vlgmr.msra.gmra.mxu1 %v4291_v32  ;;  %v3560_v12 = vor.u32 %v4106_v5, %v3557_v26  ;;  %v3269_v28 = vld [vmem:[#allocation2 + $0x558] sm:$0xf0]  ;;  %v3667_v26 = vld [vmem:[#allocation4 + $0x70] sm:$0xf] }
  0xf3   :  { %2006 = vmatpush.bf16.msrb.mxu1 %v3352_v29  ;;  %1975 = vmatmul.bf16.vlgmr.msra.gmra.mxu2 %v4285_v25  ;;  %v4042_v25 = vld [vmem:[#allocation2 + $0x58c] sm:$0xf]  ;;  %v3272_v43 = vor.u32 %v4034_v23, %v3269_v28  ;;  %v3493_v5 = vld [vmem:[#allocation2 + $0x718] sm:$0xf0]  ;;  %v3668_v13 = vor.u32 %v4136_v30, %v3667_v26  ;;  %v4132_v23 = vld [vmem:[#allocation4 + $0x54] sm:$0xf0] }
  0xf4   :  { %2019 = vmatpush.bf16.msrb.mxu2 %v3480_v33  ;;  %1988 = vmatmul.bf16.vlgmr.msra.gmra.mxu3 %v4289_v31  ;;  %v3176_v31 = vor.u32 %v4010_v63, %v3173_v0  ;;  %v3304_v32 = vor.u32 %v4042_v25, %v3301_v2  ;;  %v4066_v29 = vld [vmem:[#allocation2 + $0x64c] sm:$0xf]  ;;  %v3397_v33 = vld [vmem:[#allocation2 + $0x658] sm:$0xf0]  ;;  %v4124_v26 = vld [vmem:[#allocation4 + $0x14] sm:$0xf0] }
  0xf5   :  { %2032 = vmatpush.bf16.msrb.mxu3 %v3608_v34  ;;  %v3144_v34 = vor.u32 %v4002_v21, %v3141_v22  ;;  %v3400_v44 = vor.u32 %v4066_v29, %v3397_v33  ;;  %v3237_v63 = vld [vmem:[#allocation2 + $0x518] sm:$0xf0]  ;;  %v3651_v22 = vld [vmem:[#allocation4 + $0x50] sm:$0xf] }
  0xf6   :  { %1994 = vmatpush.bf16.msrb.mxu0 %v3208_v47  ;;  %v4344_v24 = vpop.f32.mrf.mxu2  ;;  %v1744_v41 = vpop.f32.mrf.mxu0  ;;  %v4030_v47 = vld [vmem:[#allocation2 + $0x52c] sm:$0xf]  ;;  %v3365_v2 = vld [vmem:[#allocation2 + $0x618] sm:$0xf0]  ;;  %v3652_v28 = vor.u32 %v4132_v23, %v3651_v22  ;;  %v3763_v22 = vld [vmem:[#allocation4 + $0x130] sm:$0xf] }
  0xf7   :  { %2007 = vmatpush.bf16.msrb.mxu1 %v3336_v48  ;;  %v4346_v35 = vpop.f32.mrf.mxu3  ;;  %v1757_v48 = vpop.f32.mrf.mxu1  ;;  %v3256_v59 = vor.u32 %v4030_v47, %v3253_v51  ;;  %v4168_v41 = vld [vmem:[#allocation4 + $0x174] sm:$0xf0]  ;;  %v4166_v51 = vld [vmem:[#allocation4 + $0x164] sm:$0xf0] }
  0xf8   :  { %2020 = vmatpush.bf16.msrb.mxu2 %v3464_v49  ;;  %v3528_v49 = vor.u32 %v4098_v37, %v3525_v38  ;;  %v4130_v37 = vld [vmem:[#allocation4 + $0x44] sm:$0xf0]  ;;  %v3707_v38 = vld [vmem:[#allocation4 + $0xc0] sm:$0xf]  ;;  %v4160_v23 = vld [vmem:[#allocation4 + $0x134] sm:$0xf0] }
  0xf9   :  { %2033 = vmatpush.bf16.msrb.mxu3 %v3592_v54  ;;  %v4094_v54 = vld [vmem:[#allocation2 + $0x72c] sm:$0xf] }
  0xfa   :  { %1995 = vmatpush.bf16.msrb.mxu0 %v3192_v60  ;;  %v3384_v60 = vor.u32 %v4062_v52, %v3381_v53  ;;  %v3512_v25 = vor.u32 %v4094_v54, %v3509_v55 }
  0xfb   :  { %2008 = vmatpush.bf16.msrb.mxu1 %v3320_v61  ;;  %v3109_v61 = vld [vmem:[#allocation2 + $0x418] sm:$0xf0] }
  0xfc   :  { %2021 = vmatpush.bf16.msrb.mxu2 %v3448_v62  ;;  %v4026_v62 = vld [vmem:[#allocation2 + $0x50c] sm:$0xf] }
  0xfd   :  { %2034 = vmatpush.bf16.msrb.mxu3 %v3576_v1  ;;  %v4058_v1 = vld [vmem:[#allocation2 + $0x60c] sm:$0xf]  ;;  %v3240_v9 = vor.u32 %v4026_v62, %v3237_v63  ;;  %v3779_v63 = vld [vmem:[#allocation4 + $0x150] sm:$0xf] }
  0xfe   :  { %1996 = vmatpush.bf16.msrb.mxu0 %v3176_v31  ;;  %v1770_v0 = vpop.f32.mrf.mxu2  ;;  %v1743_v31 = vadd.f32 %v4340_v6, %v342_v56  ;;  %v3368_v10 = vor.u32 %v4058_v1, %v3365_v2  ;;  %v3660_v6 = vor.u32 %v4134_v17, %v3659_v16  ;;  %v3627_v56 = vld [vmem:[#allocation4 + $0x20] sm:$0xf] }
  0xff   :  { %2009 = vmatpush.bf16.msrb.mxu1 %v3304_v32  ;;  %v1783_v4 = vpop.f32.mrf.mxu3  ;;  %v3112_v32 = vor.u32 %v3994_v58, %v3109_v61  ;;  %v3691_v58 = vld [vmem:[#allocation4 + $0xa0] sm:$0xf]  ;;  %v4164_v0 = vld [vmem:[#allocation4 + $0x154] sm:$0xf0] }
 0x100   :  { %2022 = vmatpush.bf16.msrb.mxu2 %v3432_v7  ;;  %v3731_v7 = vld [vmem:[#allocation4 + $0xf0] sm:$0xf]  ;;  %v1756_v15 = vadd.f32 %v4342_v11, %v1743_v31 }
 0x101   :  { %2035 = vmatpush.bf16.msrb.mxu3 %v3560_v12  ;;  %v3496_v12 = vor.u32 %v4090_v3, %v3493_v5  ;;  %v3732_v14 = vor.u32 %v4152_v8, %v3731_v7  ;;  %v3715_v11 = vld [vmem:[#allocation4 + $0xd0] sm:$0xf]  ;;  %v3771_v7 = vld [vmem:[#allocation4 + $0x140] sm:$0xf]  ;;  %v2049_v8 = vmul.f32 0.2, %v4334_v50 }
 0x102   :  { %1997 = vmatpush.bf16.msrb.mxu0 %v3160_v18  ;;  %v3723_v18 = vld [vmem:[#allocation4 + $0xe0] sm:$0xf]  ;;  %v1769_v21 = vadd.f32 %v4344_v24, %v1756_v15  ;;  %v4146_v24 = vld [vmem:[#allocation4 + $0xc4] sm:$0xf0]  ;;  %v3619_v5 = vld [vmem:[#allocation4 + $0x10] sm:$0xf] }
 0x103   :  { %2010 = vmatpush.bf16.msrb.mxu1 %v3288_v19  ;;  %v4150_v19 = vld [vmem:[#allocation4 + $0xe4] sm:$0xf0]  ;;  %v3683_v31 = vld [vmem:[#allocation4 + $0x90] sm:$0xf] }
 0x104   :  { %2023 = vmatpush.bf16.msrb.mxu2 %v3416_v20  ;;  %v3724_v20 = vor.u32 %v4150_v19, %v3723_v18  ;;  %v1782_v29 = vadd.f32 %v4346_v35, %v1769_v21  ;;  %v4144_v35 = vld [vmem:[#allocation4 + $0xb4] sm:$0xf0]  ;;  %v4138_v15 = vld [vmem:[#allocation4 + $0x84] sm:$0xf0]  ;;  %v4135_v19 = vld [vmem:[#allocation4 + $0x74] sm:$0xf] }
 0x105   :  { %2036 = vmatpush.bf16.msrb.mxu3 %v3544_v27  ;;  %v4148_v27 = vld [vmem:[#allocation4 + $0xd4] sm:$0xf0]  ;;  %v3700_v55 = vor.u32 %v4144_v35, %v3699_v46 }
 0x106   :  { %1998 = vmatpush.bf16.msrb.mxu0 %v3144_v34  ;;  %v3716_v33 = vor.u32 %v4148_v27, %v3715_v11  ;;  %v3795_v34 = vld [vmem:[#allocation4 + $0x170] sm:$0xf]  ;;  %v4151_v11 = vld [vmem:[#allocation4 + $0xf4] sm:$0xf]  ;;  %v3733_v27 = vld [vmem:[#allocation4 + $0xf8] sm:$0xf0] }
 0x107   :  { %2011 = vmatpush.bf16.msrb.mxu1 %v3272_v43  ;;  %v3796_v43 = vor.u32 %v4168_v41, %v3795_v34  ;;  %v4133_v34 = vld [vmem:[#allocation4 + $0x64] sm:$0xf]  ;;  %v3661_v41 = vld [vmem:[#allocation4 + $0x68] sm:$0xf0]  ;;  %v4156_v35 = vld [vmem:[#allocation4 + $0x114] sm:$0xf0] }
 0x108   :  { %2024 = vmatpush.bf16.msrb.mxu2 %v3400_v44  ;;  %v3708_v44 = vor.u32 %v4146_v24, %v3707_v38  ;;  %v2053_v38 = vsel %vm2045_vm1, %v4334_v50, %v2049_v8  ;;  %v3736_v24 = vor.u32 %v4151_v11, %v3733_v27  ;;  %v3789_v8 = vld [vmem:[#allocation4 + $0x168] sm:$0xf0]  ;;  %v3621_v11 = vld [vmem:[#allocation4 + $0x18] sm:$0xf0] }
 0x109   :  { %2037 = vmatpush.bf16.msrb.mxu3 %v3528_v49  ;;  %v3787_v49 = vld [vmem:[#allocation4 + $0x160] sm:$0xf]  ;;  %v4362_v46 = vpack.c.bf16 %v2053_v38, %v2053_v38 }
 0x10a   :  { %1999 = vmatpush.bf16.msrb.mxu0 %v3128_v57  ;;  %v3788_v53 = vor.u32 %v4166_v51, %v3787_v49  ;;  %v4126_v57 = vld [vmem:[#allocation4 + $0x24] sm:$0xf0]  ;;  %v4131_v49 = vld [vmem:[#allocation4 + $0x54] sm:$0xf]  ;;  %v3653_v51 = vld [vmem:[#allocation4 + $0x58] sm:$0xf0] }
 0x10b   :  { %2012 = vmatpush.bf16.msrb.mxu1 %v3256_v59  ;;  %v3628_v1 = vor.u32 %v4126_v57, %v3627_v56  ;;  %v4154_v56 = vld [vmem:[#allocation4 + $0x104] sm:$0xf0]  ;;  %v4167_v57 = vld [vmem:[#allocation4 + $0x174] sm:$0xf] }
 0x10c   :  { %2025 = vmatpush.bf16.msrb.mxu2 %v3384_v60  ;;  %v4142_v60 = vld [vmem:[#allocation4 + $0xa4] sm:$0xf0] }
 0x10d   :  { %2038 = vmatpush.bf16.msrb.mxu3 %v3512_v25  ;;  %v3780_v25 = vor.u32 %v4164_v0, %v3779_v63  ;;  %v3692_v3 = vor.u32 %v4142_v60, %v3691_v58  ;;  %v3797_v58 = vld [vmem:[#allocation4 + $0x178] sm:$0xf0]  ;;  %v4145_v0 = vld [vmem:[#allocation4 + $0xc4] sm:$0xf] }
 0x10e   :  { %2000 = vmatpush.bf16.msrb.mxu0 %v3112_v32  ;;  %v4140_v32 = vld [vmem:[#allocation4 + $0x94] sm:$0xf0] }
 0x10f   :  { %2013 = vmatpush.bf16.msrb.mxu1 %v3240_v9  ;;  %v1807_v48 = vpop.f32.mrf.mxu1  ;;  %v3611_v9 = vld [vmem:[#allocation4] sm:$0xf]  ;;  %v3684_v18 = vor.u32 %v4140_v32, %v3683_v31  ;;  %v3701_v31 = vld [vmem:[#allocation4 + $0xb8] sm:$0xf0] }
 0x110   :  { %2026 = vmatpush.bf16.msrb.mxu2 %v3368_v10  ;;  %v4162_v10 = vld [vmem:[#allocation4 + $0x144] sm:$0xf0] }
 0x111   :  { %2039 = vmatpush.bf16.msrb.mxu3 %v3496_v12  ;;  %2001 = vmatmul.bf16.vlgmr.msrb.gmra.mxu0 %v4302_v39  ;;  %v3643_v39 = vld [vmem:[#allocation4 + $0x40] sm:$0xf]  ;;  %v3620_v12 = vor.u32 %v4124_v26, %v3619_v5  ;;  %v3772_v16 = vor.u32 %v4162_v10, %v3771_v7  ;;  %v3637_v5 = vld [vmem:[#allocation4 + $0x38] sm:$0xf0]  ;;  %v4143_v26 = vld [vmem:[#allocation4 + $0xb4] sm:$0xf] }
 0x112   :  { %2450 = vmatpush.bf16.msra.mxu0 %v3668_v13  ;;  %2014 = vmatmul.bf16.vlgmr.msrb.gmra.mxu1 %v4306_v42  ;;  %v3644_v42 = vor.u32 %v4130_v37, %v3643_v39  ;;  %v4122_v13 = vld [vmem:[#allocation4 + $0x4] sm:$0xf0]  ;;  %v4165_v7 = vld [vmem:[#allocation4 + $0x164] sm:$0xf] }
 0x113   :  { %2463 = vmatpush.bf16.msra.mxu1 %v3732_v14  ;;  %2027 = vmatmul.bf16.vlgmr.msrb.gmra.mxu2 %v4300_v36  ;;  %v1794_v36 = vpop.f32.mrf.mxu0  ;;  %v3675_v14 = vld [vmem:[#allocation4 + $0x80] sm:$0xf] }
 0x114   :  { %2040 = vmatmul.bf16.vlgmr.msrb.gmra.mxu3 %v4304_v40  ;;  %v4128_v40 = vld [vmem:[#allocation4 + $0x34] sm:$0xf0]  ;;  %v1795_v47 = vadd.f32 %v1794_v36, %v1782_v29  ;;  %2476 = vmatpush.bf16.msra.mxu2 %v3796_v43  ;;  %v3612_v29 = vor.u32 %v4122_v13, %v3611_v9  ;;  %v3676_v39 = vor.u32 %v4138_v15, %v3675_v14  ;;  %v4149_v43 = vld [vmem:[#allocation4 + $0xe4] sm:$0xf]  ;;  %v3755_v36 = vld [vmem:[#allocation4 + $0x120] sm:$0xf] }
 0x115   :  { %v3636_v54 = vor.u32 %v4128_v40, %v3635_v45  ;;  %v3792_v9 = vor.u32 %v4165_v7, %v3789_v8  ;;  %v4125_v13 = vld [vmem:[#allocation4 + $0x24] sm:$0xf]  ;;  %v3629_v14 = vld [vmem:[#allocation4 + $0x28] sm:$0xf0]  ;;  %v3843_v7 = vld [vmem:[#allocation4 + $0x1d0] sm:$0xf] }
 0x116   :  { %2451 = vmatpush.bf16.msra.mxu0 %v3660_v6  ;;  %v1808_v52 = vadd.f32 %v1807_v48, %v1795_v47  ;;  %v1820_v59 = vpop.f32.mrf.mxu2  ;;  %v3669_v6 = vld [vmem:[#allocation4 + $0x78] sm:$0xf0]  ;;  %v3664_v47 = vor.u32 %v4133_v34, %v3661_v41  ;;  %v3747_v48 = vld [vmem:[#allocation4 + $0x110] sm:$0xf]  ;;  %v4141_v15 = vld [vmem:[#allocation4 + $0xa4] sm:$0xf] }
 0x117   :  { %2464 = vmatpush.bf16.msra.mxu1 %v3724_v20  ;;  %v1833_v62 = vpop.f32.mrf.mxu3  ;;  %v1809_v30 = vpop.f32.mrf.mxu1  ;;  %v3672_v37 = vor.u32 %v4135_v19, %v3669_v6  ;;  %v4163_v19 = vld [vmem:[#allocation4 + $0x154] sm:$0xf]  ;;  %v3781_v6 = vld [vmem:[#allocation4 + $0x158] sm:$0xf0]  ;;  %v4180_v8 = vld [vmem:[#allocation4 + $0x1d4] sm:$0xf0] }
 0x118   :  { %2477 = vmatpush.bf16.msra.mxu2 %v3788_v53  ;;  %v1821_v61 = vadd.f32 %v1820_v59, %v1808_v52  ;;  %v4147_v52 = vld [vmem:[#allocation4 + $0xd4] sm:$0xf]  ;;  %v3748_v53 = vor.u32 %v4156_v35, %v3747_v48  ;;  %v3656_v59 = vor.u32 %v4131_v49, %v3653_v51  ;;  %v3765_v35 = vld [vmem:[#allocation4 + $0x138] sm:$0xf0]  ;;  %v4157_v51 = vld [vmem:[#allocation4 + $0x124] sm:$0xf] }
 0x119   :  { %v4159_v48 = vld [vmem:[#allocation4 + $0x134] sm:$0xf] }
 0x11a   :  { %2452 = vmatpush.bf16.msra.mxu0 %v3652_v28  ;;  %v1834_v4 = vadd.f32 %v1833_v62, %v1821_v61  ;;  %v3764_v28 = vor.u32 %v4160_v23, %v3763_v22  ;;  %v4129_v61 = vld [vmem:[#allocation4 + $0x44] sm:$0xf]  ;;  %v3645_v62 = vld [vmem:[#allocation4 + $0x48] sm:$0xf0]  ;;  %v4123_v23 = vld [vmem:[#allocation4 + $0x14] sm:$0xf]  ;;  %v3768_v49 = vor.u32 %v4159_v48, %v3765_v35 }
 0x11b   :  { %2465 = vmatpush.bf16.msra.mxu1 %v3716_v33  ;;  %v1796_v2 = vpop.f32.mrf.mxu0  ;;  %v3624_v38 = vor.u32 %v4123_v23, %v3621_v11  ;;  %v3819_v23 = vld [vmem:[#allocation4 + $0x1a0] sm:$0xf]  ;;  %v4174_v11 = vld [vmem:[#allocation4 + $0x1a4] sm:$0xf0] }
 0x11c   :  { %2478 = vmatpush.bf16.msra.mxu2 %v3780_v25  ;;  %v2050_v17 = vmul.f32 0.2, %v1834_v4  ;;  %vm2046_vm0 = vcmp.gt.f32.partialorder %v1834_v4, 0.0  ;;  %v3709_v25 = vld [vmem:[#allocation4 + $0xc8] sm:$0xf0]  ;;  %v3648_v2 = vor.u32 %v4129_v61, %v3645_v62 }
 0x11d   :  { %v3749_v61 = vld [vmem:[#allocation4 + $0x118] sm:$0xf0] }
 0x11e   :  { %2453 = vmatpush.bf16.msra.mxu0 %v3644_v42  ;;  %v1822_v20 = vpop.f32.mrf.mxu2  ;;  %v2054_v33 = vsel %vm2046_vm0, %v1834_v4, %v2050_v17  ;;  %v3725_v42 = vld [vmem:[#allocation4 + $0xe8] sm:$0xf0]  ;;  %v4127_v4 = vld [vmem:[#allocation4 + $0x34] sm:$0xf] }
 0x11f   :  { %2466 = vmatpush.bf16.msra.mxu1 %v3708_v44  ;;  %v1835_v21 = vpop.f32.mrf.mxu3  ;;  %v4158_v44 = vld [vmem:[#allocation4 + $0x124] sm:$0xf0]  ;;  %v4360_v45 = vpack.c.bf16 %v2054_v33, %v2054_v33  ;;  %v3728_v50 = vor.u32 %v4149_v43, %v3725_v42  ;;  %v3640_v10 = vor.u32 %v4127_v4, %v3637_v5  ;;  %v3632_v20 = vor.u32 %v4125_v13, %v3629_v14  ;;  %v4121_v42 = vld [vmem:[#allocation4 + $0x4] sm:$0xf]  ;;  %v3851_v4 = vld [vmem:[#allocation4 + $0x1e0] sm:$0xf] }
 0x120   :  { %2479 = vmatpush.bf16.msra.mxu2 %v3772_v16  ;;  %v3756_v40 = vor.u32 %v4158_v44, %v3755_v36  ;;  %v3693_v16 = vld [vmem:[#allocation4 + $0xa8] sm:$0xf0]  ;;  %v3784_v21 = vor.u32 %v4163_v19, %v3781_v6  ;;  %v4137_v44 = vld [vmem:[#allocation4 + $0x84] sm:$0xf]  ;;  %v4182_v5 = vld [vmem:[#allocation4 + $0x1e4] sm:$0xf0] }
 0x121   :  { %v3696_v22 = vor.u32 %v4141_v15, %v3693_v16  ;;  %v3613_v36 = vld [vmem:[#allocation4 + $0x8] sm:$0xf0]  ;;  %v4178_v14 = vld [vmem:[#allocation4 + $0x1c4] sm:$0xf0]  ;;  %v3827_v16 = vld [vmem:[#allocation4 + $0x1b0] sm:$0xf] }
 0x122   :  { %2454 = vmatpush.bf16.msra.mxu0 %v3636_v54  ;;  %v3717_v54 = vld [vmem:[#allocation4 + $0xd8] sm:$0xf0] }
 0x123   :  { %2467 = vmatpush.bf16.msra.mxu1 %v3700_v55  ;;  %v3739_v55 = vld [vmem:[#allocation4 + $0x100] sm:$0xf]  ;;  %v3720_v60 = vor.u32 %v4147_v52, %v3717_v54  ;;  %v3757_v52 = vld [vmem:[#allocation4 + $0x128] sm:$0xf0]  ;;  %v3616_v54 = vor.u32 %v4121_v42, %v3613_v36  ;;  %v4183_v42 = vld [vmem:[#allocation4 + $0x1f4] sm:$0xf] }
 0x124   :  { %2480 = vmatpush.bf16.msra.mxu2 %v3764_v28  ;;  %v3740_v63 = vor.u32 %v4154_v56, %v3739_v55  ;;  %v4139_v28 = vld [vmem:[#allocation4 + $0x94] sm:$0xf]  ;;  %v3859_v55 = vld [vmem:[#allocation4 + $0x1f0] sm:$0xf]  ;;  %v3861_v36 = vld [vmem:[#allocation4 + $0x1f8] sm:$0xf0] }
 0x126   :  { %2455 = vmatpush.bf16.msra.mxu0 %v3628_v1  ;;  %v3800_v1 = vor.u32 %v4167_v57, %v3797_v58  ;;  %v4184_v57 = vld [vmem:[#allocation4 + $0x1f4] sm:$0xf0]  ;;  %v3760_v58 = vor.u32 %v4157_v51, %v3757_v52  ;;  %v3845_v51 = vld [vmem:[#allocation4 + $0x1d8] sm:$0xf0] }
 0x127   :  { %2468 = vmatpush.bf16.msra.mxu1 %v3692_v3  ;;  %v3712_v3 = vor.u32 %v4145_v0, %v3709_v25  ;;  %v4153_v0 = vld [vmem:[#allocation4 + $0x104] sm:$0xf]  ;;  %v3741_v25 = vld [vmem:[#allocation4 + $0x108] sm:$0xf0] }
 0x128   :  { %2481 = vmatpush.bf16.msra.mxu2 %v3756_v40  ;;  %v3677_v40 = vld [vmem:[#allocation4 + $0x88] sm:$0xf0] }
 0x129   :  { %v3680_v56 = vor.u32 %v4137_v44, %v3677_v40  ;;  %v3864_v44 = vor.u32 %v4183_v42, %v3861_v36  ;;  %v4181_v40 = vld [vmem:[#allocation4 + $0x1e4] sm:$0xf] }
 0x12a   :  { %2456 = vmatpush.bf16.msra.mxu0 %v3620_v12  ;;  %v3704_v12 = vor.u32 %v4143_v26, %v3701_v31 }
 0x12b   :  { %2469 = vmatpush.bf16.msra.mxu1 %v3684_v18 }
 0x12c   :  { %2482 = vmatpush.bf16.msra.mxu2 %v3748_v53 }
 0x12e   :  { %2457 = vmatpush.bf16.msra.mxu0 %v3612_v29  ;;  %v1846_v30 = vpop.f32.mrf.mxu0  ;;  %v3685_v29 = vld [vmem:[#allocation4 + $0x98] sm:$0xf0] }
 0x12f   :  { %2470 = vmatpush.bf16.msra.mxu1 %v3676_v39  ;;  %v4366_v32 = vpop.f32.mrf.mxu1  ;;  %v4161_v39 = vld [vmem:[#allocation4 + $0x144] sm:$0xf]  ;;  %v3688_v43 = vor.u32 %v4139_v28, %v3685_v29 }
 0x130   :  { %2483 = vmatpush.bf16.msra.mxu2 %v3740_v63 }
 0x131   :  { %2458 = vmatmul.bf16.vlgmr.msra.gmra.mxu0 %v4362_v46 }
 0x132   :  { %2502 = vmatpush.bf16.msrb.mxu0 %v3672_v37  ;;  %2471 = vmatmul.bf16.vlgmr.msra.gmra.mxu1 %v4360_v45  ;;  %v3773_v37 = vld [vmem:[#allocation4 + $0x148] sm:$0xf0] }
 0x133   :  { %2515 = vmatpush.bf16.msrb.mxu1 %v3736_v24  ;;  %v4371_v24 = vld [vmem:[%s4393_s3] sm:$0xf]  ;;  %v3776_v41 = vor.u32 %v4161_v39, %v3773_v37  ;;  %v3811_v39 = vld [vmem:[#allocation4 + $0x190] sm:$0xf] }
 0x134   :  { %2528 = vmatpush.bf16.msrb.mxu2 %v3800_v1  ;;  %v343_v34 = vperm.slane %v4371_v24, 2  ;;  %v4172_v37 = vld [vmem:[#allocation4 + $0x194] sm:$0xf0] }
 0x136   :  { %2503 = vmatpush.bf16.msrb.mxu0 %v3664_v47  ;;  %v1872_v17 = vpop.f32.mrf.mxu2  ;;  %v1848_v27 = vpop.f32.mrf.mxu0  ;;  %v1847_v53 = vadd.f32 %v1846_v30, %v343_v34  ;;  %v3852_v30 = vor.u32 %v4182_v5, %v3851_v4  ;;  %v3803_v34 = vld [vmem:[#allocation4 + $0x180] sm:$0xf]  ;;  %v4171_v5 = vld [vmem:[#allocation4 + $0x194] sm:$0xf] }
 0x137   :  { %2516 = vmatpush.bf16.msrb.mxu1 %v3728_v50  ;;  %v1885_v18 = vpop.f32.mrf.mxu3  ;;  %v1861_v33 = vpop.f32.mrf.mxu1 }
 0x138   :  { %2529 = vmatpush.bf16.msrb.mxu2 %v3792_v9  ;;  %v1860_v62 = vadd.f32 %v4366_v32, %v1847_v53  ;;  %v3844_v9 = vor.u32 %v4180_v8, %v3843_v7  ;;  %v3820_v33 = vor.u32 %v4174_v11, %v3819_v23  ;;  %v4169_v7 = vld [vmem:[#allocation4 + $0x184] sm:$0xf]  ;;  %v3805_v8 = vld [vmem:[#allocation4 + $0x188] sm:$0xf0]  ;;  %v52_v23 = vld [vmem:[%s4393_s3 + $0x4] sm:$0x3] }
 0x139   :  { %v2126_v11 = vperm.slane %v52_v23, 0 }
 0x13a   :  { %2504 = vmatpush.bf16.msrb.mxu0 %v3656_v59  ;;  %v3860_v59 = vor.u32 %v4184_v57, %v3859_v55  ;;  %v1873_v1 = vadd.f32 %v1872_v17, %v1860_v62  ;;  %v4176_v17 = vld [vmem:[#allocation4 + $0x1b4] sm:$0xf0]  ;;  %v3837_v57 = vld [vmem:[#allocation4 + $0x1c8] sm:$0xf0]  ;;  %v3829_v62 = vld [vmem:[#allocation4 + $0x1b8] sm:$0xf0] }
 0x13b   :  { %2517 = vmatpush.bf16.msrb.mxu1 %v3720_v60  ;;  %v4155_v60 = vld [vmem:[#allocation4 + $0x114] sm:$0xf] }
 0x13c   :  { %2530 = vmatpush.bf16.msrb.mxu2 %v3784_v21  ;;  %2489 = vmatpush.bf16.msra.mxu3 %v3860_v59  ;;  %v3752_v63 = vor.u32 %v4155_v60, %v3749_v61  ;;  %v3828_v21 = vor.u32 %v4176_v17, %v3827_v16  ;;  %v344_v60 = vperm.slane %v4371_v24, 3  ;;  %v4175_v61 = vld [vmem:[#allocation4 + $0x1b4] sm:$0xf]  ;;  %v3808_v24 = vor.u32 %v4169_v7, %v3805_v8 }
 0x13e   :  { %2505 = vmatpush.bf16.msrb.mxu0 %v3648_v2  ;;  %v1874_v47 = vpop.f32.mrf.mxu2  ;;  %v3744_v2 = vor.u32 %v4153_v0, %v3741_v25  ;;  %v3832_v0 = vor.u32 %v4175_v61, %v3829_v62  ;;  %v4173_v25 = vld [vmem:[#allocation4 + $0x1a4] sm:$0xf] }
 0x13f   :  { %2518 = vmatpush.bf16.msrb.mxu1 %v3712_v3  ;;  %v1887_v50 = vpop.f32.mrf.mxu3  ;;  %v1886_v3 = vadd.f32 %v1885_v18, %v1873_v1  ;;  %v3853_v47 = vld [vmem:[#allocation4 + $0x1e8] sm:$0xf0] }
 0x140   :  { %2531 = vmatpush.bf16.msrb.mxu2 %v3776_v41  ;;  %2490 = vmatpush.bf16.msra.mxu3 %v3852_v30  ;;  %v4170_v41 = vld [vmem:[#allocation4 + $0x184] sm:$0xf0]  ;;  %v3856_v35 = vor.u32 %v4181_v40, %v3853_v47  ;;  %v3821_v1 = vld [vmem:[#allocation4 + $0x1a8] sm:$0xf0] }
 0x142   :  { %2506 = vmatpush.bf16.msrb.mxu0 %v3640_v10 }
 0x143   :  { %2519 = vmatpush.bf16.msrb.mxu1 %v3704_v12 }
 0x144   :  { %2532 = vmatpush.bf16.msrb.mxu2 %v3768_v49  ;;  %2491 = vmatpush.bf16.msra.mxu3 %v3844_v9  ;;  %v4179_v49 = vld [vmem:[#allocation4 + $0x1d4] sm:$0xf] }
 0x145   :  { %v3848_v53 = vor.u32 %v4179_v49, %v3845_v51 }
 0x146   :  { %2507 = vmatpush.bf16.msrb.mxu0 %v3632_v20 }
 0x147   :  { %2520 = vmatpush.bf16.msrb.mxu1 %v3696_v22 }
 0x148   :  { %2533 = vmatpush.bf16.msrb.mxu2 %v3760_v58 }
 0x14a   :  { %2508 = vmatpush.bf16.msrb.mxu0 %v3624_v38  ;;  %v3812_v38 = vor.u32 %v4172_v37, %v3811_v39 }
 0x14b   :  { %2521 = vmatpush.bf16.msrb.mxu1 %v3688_v43  ;;  %v3804_v43 = vor.u32 %v4170_v41, %v3803_v34 }
 0x14c   :  { %2534 = vmatpush.bf16.msrb.mxu2 %v3752_v63 }
 0x14e   :  { %2509 = vmatpush.bf16.msrb.mxu0 %v3616_v54  ;;  %v1898_v26 = vpop.f32.mrf.mxu0 }
 0x14f   :  { %2522 = vmatpush.bf16.msrb.mxu1 %v3680_v56  ;;  %v1899_v31 = vadd.f32 %v1898_v26, %v1886_v3  ;;  %v1911_v32 = vpop.f32.mrf.mxu1  ;;  %v4177_v56 = vld [vmem:[#allocation4 + $0x1c4] sm:$0xf]  ;;  %v3824_v3 = vor.u32 %v4173_v25, %v3821_v1  ;;  %v3813_v26 = vld [vmem:[#allocation4 + $0x198] sm:$0xf0] }
 0x150   :  { %2535 = vmatpush.bf16.msrb.mxu2 %v3744_v2  ;;  %v3840_v59 = vor.u32 %v4177_v56, %v3837_v57  ;;  %v3816_v30 = vor.u32 %v4171_v5, %v3813_v26 }
 0x151   :  { %2510 = vmatmul.bf16.vlgmr.msrb.gmra.mxu0 %v4362_v46  ;;  %v1912_v46 = vadd.f32 %v1911_v32, %v1899_v31 }
 0x152   :  { %2523 = vmatmul.bf16.vlgmr.msrb.gmra.mxu1 %v4360_v45  ;;  %v3835_v45 = vld [vmem:[#allocation4 + $0x1c0] sm:$0xf] }
 0x153   :  { %v3836_v15 = vor.u32 %v4178_v14, %v3835_v45 }
 0x155   :  { %2492 = vmatpush.bf16.msra.mxu3 %v3836_v15 }
 0x156   :  { %v1924_v10 = vpop.f32.mrf.mxu2  ;;  %v1900_v19 = vpop.f32.mrf.mxu0 }
 0x157   :  { %v1925_v12 = vadd.f32 %v1924_v10, %v1912_v46  ;;  %v1937_v13 = vpop.f32.mrf.mxu3  ;;  %v1913_v6 = vpop.f32.mrf.mxu1 }
 0x159   :  { %v1938_v18 = vadd.f32 %v1937_v13, %v1925_v12  ;;  %2493 = vmatpush.bf16.msra.mxu3 %v3828_v21 }
 0x15b   :  { %vm2047_vm2 = vcmp.gt.f32.partialorder %v1938_v18, 0.0  ;;  %v2051_v20 = vmul.f32 0.2, %v1938_v18 }
 0x15d   :  { %v2055_v22 = vsel %vm2047_vm2, %v1938_v18, %v2051_v20  ;;  %2494 = vmatpush.bf16.msra.mxu3 %v3820_v33 }
 0x15e   :  { %v2059_v27 = vpack.c.bf16 %v2055_v22, %v2055_v22  ;;  %v1926_v28 = vpop.f32.mrf.mxu2 }
 0x15f   :  { %v1939_v29 = vpop.f32.mrf.mxu3 }
 0x160   :  { %2484 = vmatmul.bf16.vlgmr.msra.gmra.mxu2 %v2059_v27 }
 0x161   :  { %2495 = vmatpush.bf16.msra.mxu3 %v3812_v38  ;;  %v2127_v38 = vperm.slane %v52_v23, 1 }
 0x165   :  { %2496 = vmatpush.bf16.msra.mxu3 %v3804_v43 }
 0x169   :  { %2541 = vmatpush.bf16.msrb.mxu3 %v3864_v44 }
 0x16d   :  { %2542 = vmatpush.bf16.msrb.mxu3 %v3856_v35 }
 0x16e   :  { %v1950_v48 = vpop.f32.mrf.mxu0 }
 0x16f   :  { %v1963_v50 = vpop.f32.mrf.mxu1  ;;  %v1951_v4 = vadd.f32 %v1950_v48, %v344_v60 }
 0x170   :  { %2536 = vmatmul.bf16.vlgmr.msrb.gmra.mxu2 %v2059_v27 }
 0x171   :  { %2543 = vmatpush.bf16.msrb.mxu3 %v3848_v53  ;;  %v1964_v31 = vadd.f32 %v1963_v50, %v1951_v4  ;;  %v4191_v4 = vld [vmem:[%s4393_s3 + $0x8] ss:$0 sm:$0xff] }
 0x175   :  { %2544 = vmatpush.bf16.msrb.mxu3 %v3840_v59 }
 0x176   :  { %v1976_v52 = vpop.f32.mrf.mxu2  ;;  %v1952_v55 = vpop.f32.mrf.mxu0 }
 0x177   :  { %v1989_v54 = vpop.f32.mrf.mxu3  ;;  %v1965_v58 = vpop.f32.mrf.mxu1  ;;  %v1977_v32 = vadd.f32 %v1976_v52, %v1964_v31 }
 0x179   :  { %2545 = vmatpush.bf16.msrb.mxu3 %v3832_v0  ;;  %v1990_v9 = vadd.f32 %v1989_v54, %v1977_v32  ;;  %v53_v54 = vld [vmem:[%s4393_s3 + $0x6] sm:$0x3] }
 0x17a   :  { %v2561_v57 = vperm.slane %v53_v54, 0  ;;  %v2562_v60 = vperm.slane %v53_v54, 1 }
 0x17d   :  { %2546 = vmatpush.bf16.msrb.mxu3 %v3824_v3 }
 0x17e   :  { %v1978_v63 = vpop.f32.mrf.mxu2 }
 0x17f   :  { %v1991_v2 = vpop.f32.mrf.mxu3 }
 0x181   :  { %2547 = vmatpush.bf16.msrb.mxu3 %v3816_v30 }
 0x185   :  { %2548 = vmatpush.bf16.msrb.mxu3 %v3808_v24 }
 0x18e   :  { %v2002_v46 = vpop.f32.mrf.mxu0 }
 0x18f   :  { %v2015_v10 = vpop.f32.mrf.mxu1  ;;  %v2003_v12 = vadd.f32 %v2002_v46, %v1990_v9 }
 0x191   :  { %v2016_v13 = vadd.f32 %v2015_v10, %v2003_v12 }
 0x196   :  { %v2028_v45 = vpop.f32.mrf.mxu2  ;;  %v2004_v16 = vpop.f32.mrf.mxu0 }
 0x197   :  { %v2029_v14 = vadd.f32 %v2028_v45, %v2016_v13  ;;  %v2041_v15 = vpop.f32.mrf.mxu3  ;;  %v2017_v17 = vpop.f32.mrf.mxu1 }
 0x199   :  { %v2042_v18 = vadd.f32 %v2041_v15, %v2029_v14 }
 0x19b   :  { %vm2048_vm3 = vcmp.gt.f32.partialorder %v2042_v18, 0.0  ;;  %v2052_v19 = vmul.f32 0.2, %v2042_v18 }
 0x19d   :  { %v2056_v6 = vsel %vm2048_vm3, %v2042_v18, %v2052_v19 }
 0x19e   :  { %v2060_v20 = vpack.c.bf16 %v2056_v6, %v2056_v6  ;;  %v2030_v21 = vpop.f32.mrf.mxu2 }
 0x19f   :  { %v2043_v22 = vpop.f32.mrf.mxu3 }
 0x1a0   :  { %2497 = vmatmul.bf16.vlgmr.msra.gmra.mxu3 %v2060_v20 }
 0x1ae   :  { %v2459_v27 = vpop.f32.mrf.mxu0 }
 0x1af   :  { %v2460_v28 = vadd.f32 %v2459_v27, %v2126_v11  ;;  %v2472_v29 = vpop.f32.mrf.mxu1 }
 0x1b0   :  { %2549 = vmatmul.bf16.vlgmr.msrb.gmra.mxu3 %v2060_v20 }
 0x1b1   :  { %v2473_v33 = vadd.f32 %v2472_v29, %v2460_v28 }
 0x1b6   :  { %v2461_v39 = vpop.f32.mrf.mxu0 }
 0x1b7   :  { %v2474_v37 = vpop.f32.mrf.mxu1 }
 0x1ce   :  { %v2511_v34 = vpop.f32.mrf.mxu0 }
 0x1cf   :  { %v2512_v41 = vadd.f32 %v2511_v34, %v2127_v38  ;;  %v2524_v43 = vpop.f32.mrf.mxu1 }
 0x1d1   :  { %v2525_v42 = vadd.f32 %v2524_v43, %v2512_v41 }
 0x1d6   :  { %v2513_v36 = vpop.f32.mrf.mxu0 }
 0x1d7   :  { %v2526_v44 = vpop.f32.mrf.mxu1 }
 0x1e3   :  { %v2485_v40 = vpop.f32.mrf.mxu2 }
 0x1e4   :  { %v2486_v47 = vadd.f32 %v2485_v40, %v2473_v33 }
 0x1eb   :  { %v2487_v48 = vpop.f32.mrf.mxu2 }
 0x1f3   :  { %v2537_v35 = vpop.f32.mrf.mxu2 }
 0x1f4   :  { %v2538_v55 = vadd.f32 %v2537_v35, %v2525_v42 }
 0x1fb   :  { %v2539_v50 = vpop.f32.mrf.mxu2 }
 0x223   :  { %v2498_v49 = vpop.f32.mrf.mxu3 }
 0x224   :  { %v2499_v52 = vadd.f32 %v2498_v49, %v2486_v47 }
 0x226   :  { %v2556_v53 = vmul.f32 0.2, %v2499_v52  ;;  %vm2554_vm4 = vcmp.gt.f32.partialorder %v2499_v52, 0.0 }
 0x228   :  { %v2558_v59 = vsel %vm2554_vm4, %v2499_v52, %v2556_v53 }
 0x229   :  { %v2565_v62 = vmul.f32 %v2561_v57, %v2558_v59 }
 0x22b   :  { %v2500_v51 = vpop.f32.mrf.mxu3  ;;  %v2568_v1 = vsel %vm2567_vm6, %v2565_v62, 0.0 }
 0x233   :  { %v2550_v56 = vpop.f32.mrf.mxu3 }
 0x234   :  { %v2551_v58 = vadd.f32 %v2550_v56, %v2538_v55 }
 0x236   :  { %vm2555_vm5 = vcmp.gt.f32.partialorder %v2551_v58, 0.0  ;;  %v2557_v61 = vmul.f32 0.2, %v2551_v58 }
 0x238   :  { %v2559_v63 = vsel %vm2555_vm5, %v2551_v58, %v2557_v61 }
 0x239   :  { %v2566_v0 = vmul.f32 %v2562_v60, %v2559_v63 }
 0x23b   :  { %v2552_v25 = vpop.f32.mrf.mxu3  ;;  %v2569_v2 = vsel %vm2567_vm6, %v2566_v0, 0.0 }
 0x23c   :  { %v2570_v3 = vadd.f32 %v2569_v2, %v2568_v1 }
 0x23e   :  { %2571 = vadd.xlane.f32.xlu0 %v2570_v3 }
 0x2b1   :  { %v2572_v5 = vpop.xlane.xlu0 %2571 }
 0x2b2   :  { %v2576_v26 = vadd.f32 %v4191_v4, %v2572_v5 }
 0x2b4   :  { %2578 = vst.msk [vmem:[%s4394_s4] sm:$0x3] %vm2577_vm7, %v2576_v26 }
 0x2b5   :  { %2583 = vsyncpa [#allocation3], 1 }
 0x2b6   :  { %2584 = vsyncpa [#allocation5], 1 }

</bundles_post_ra>
